<compile_context>
chip_gen: v5e
topology: v5e:2x2
jax: 0.10.0
libtpu: 0.0.40
codegen_flags: <defaults>
</compile_context>

<pallas_src>
import functools

import jax
import jax.numpy as jnp
from jax import lax
from jax.experimental import pallas as pl
from jax.experimental.pallas import tpu as pltpu


def _g_attention_kernel(x_ref, wkv_ref, wq_ref, gk_ref, bk_ref, gv_ref, bv_ref,
                        wo_ref, bo_ref, out_ref, scores_ref, m_ref,
                        *, heads, dim_head, seq_len, eps):
    phase = pl.program_id(1)
    nt = pl.program_id(2)
    d = dim_head
    inner = heads * dim_head

    def layernorm(t, g, b):           # t: (tn, d) f32 ; g, b: (1, d) f32
        mu = jnp.mean(t, axis=-1, keepdims=True)
        var = jnp.mean(jnp.square(t - mu), axis=-1, keepdims=True)
        return (t - mu) * lax.rsqrt(var + eps) * g + b

    # ---- phase 0: accumulate per-head scores  S_h += k_h^T v_h  over n tiles.
    @pl.when(phase == 0)
    def _():
        @pl.when(nt == 0)
        def _():
            scores_ref[...] = jnp.zeros_like(scores_ref)

        xb = x_ref[0]                                       # (tn, dim) bf16
        kv = jnp.dot(xb, wkv_ref[...],                      # one fat MXU matmul
                     preferred_element_type=jnp.float32)    # (tn, 2*inner) f32

        for h in range(heads):                              # static unroll
            k_h = layernorm(kv[:, h * d:(h + 1) * d], gk_ref[h], bk_ref[h])
            v_h = layernorm(kv[:, inner + h * d:inner + (h + 1) * d],
                            gv_ref[h], bv_ref[h])
            # k^T v without materializing a transpose: contract the seq axis.
            scores_ref[h] += lax.dot_general(
                k_h.astype(jnp.bfloat16), v_h.astype(jnp.bfloat16),
                (((0,), (0,)), ((), ())),
                preferred_element_type=jnp.float32)         # (d, d) f32

    # ---- phase 1, first tile: fold 1/seq_len + output projection into M.
    @pl.when((phase == 1) & (nt == 0))
    def _():
        inv_n = 1.0 / float(seq_len)
        for h in range(heads):
            s_h = (scores_ref[h] * inv_n).astype(jnp.bfloat16)        # (d, d)
            m_ref[h * d:(h + 1) * d, :] = jnp.dot(
                s_h, wo_ref[h],
                preferred_element_type=jnp.float32).astype(jnp.bfloat16)

    # ---- phase 1: out tile = (x_tile @ Wq) @ M + b_out  (two fat matmuls,
    #      one store per output tile).
    @pl.when(phase == 1)
    def _():
        xb = x_ref[0]                                        # (tn, dim) bf16
        q = jnp.dot(xb, wq_ref[...],
                    preferred_element_type=jnp.float32)      # (tn, inner) f32
        y = jnp.dot(q.astype(jnp.bfloat16), m_ref[...],
                    preferred_element_type=jnp.float32)      # (tn, dim) f32
        out_ref[0] = (y + bo_ref[...]).astype(out_ref.dtype)


def g_attention(x, wqkv, gamma_k, beta_k, gamma_v, beta_v, wout, bout,
                *, heads, dim_head, eps=1e-5, block_n=None):
    """G_Attention forward (type='layernorm', dropout=0.0).

    x: (B, N, dim) f32.  Weights in nn.Linear layout:
      wqkv: (3*inner, dim)  [to_qkv.weight, no bias]
      wout: (dim, inner), bout: (dim,)  [to_out]
      gamma/beta_{k,v}: (heads, dim_head)  [per-head LayerNorm affine]
    Note: self.scale is defined but never used in the PyTorch forward, so it is
    intentionally not applied.
    """
    b, n, dim = x.shape
    inner = heads * dim_head
    assert wqkv.shape == (3 * inner, dim)
    assert wout.shape == (dim, inner)
    assert gamma_k.shape == (heads, dim_head)

    # n-tile size: biggest convenient block; bounds VMEM on v7x (64 MiB).
    if block_n is None:
        block_n = n
        for cand in (1024, 512, 256, 128):
            if n > cand and n % cand == 0:
                block_n = cand
                break
    assert block_n == n or (n % block_n == 0 and block_n % 8 == 0), \
        "block_n must divide N and be a multiple of 8 (or equal N)"
    n_tiles = n // block_n

    # --- weight prep (plain JAX glue): bf16 MXU operands, f32 LN params. ---
    wq, wk, wv = jnp.split(wqkv, 3, axis=0)                         # (inner, dim)
    wq_t = wq.T.astype(jnp.bfloat16)                                # (dim, inner)
    wkv_t = jnp.concatenate([wk, wv], axis=0).T.astype(jnp.bfloat16)  # (dim, 2*inner)
    wo_h = wout.T.reshape(heads, dim_head, dim).astype(jnp.bfloat16)  # (h, d, dim)
    bo = bout.reshape(1, dim).astype(jnp.float32)

    gk = gamma_k.reshape(heads, 1, dim_head).astype(jnp.float32)
    bk = beta_k.reshape(heads, 1, dim_head).astype(jnp.float32)
    gv = gamma_v.reshape(heads, 1, dim_head).astype(jnp.float32)
    bv = beta_v.reshape(heads, 1, dim_head).astype(jnp.float32)
    x_bf = x.astype(jnp.bfloat16)

    kernel = functools.partial(_g_attention_kernel, heads=heads,
                               dim_head=dim_head, seq_len=n, eps=eps)

    grid = (b, 2, n_tiles)                      # (batch, phase, n_tile)

    def const(arr):                              # whole array, fetched once
        return pl.BlockSpec(arr.shape, lambda bi, p, t, nd=arr.ndim: (0,) * nd)

    x_spec = pl.BlockSpec((1, block_n, dim), lambda bi, p, t: (bi, t, 0))
    # Output tiles only advance during phase 1 (p=1); each tile is written
    # exactly once, so no garbage / partial blocks ever reach HBM.
    out_spec = pl.BlockSpec((1, block_n, dim), lambda bi, p, t: (bi, p * t, 0))

    return pl.pallas_call(
        kernel,
        out_shape=jax.ShapeDtypeStruct((b, n, dim), jnp.float32),
        grid_spec=pltpu.PrefetchScalarGridSpec(
            num_scalar_prefetch=0,
            grid=grid,
            in_specs=[x_spec, const(wkv_t), const(wq_t),
                      const(gk), const(bk), const(gv), const(bv),
                      const(wo_h), const(bo)],
            out_specs=out_spec,
            scratch_shapes=[
                pltpu.VMEM((heads, dim_head, dim_head), jnp.float32),  # scores
                pltpu.VMEM((inner, dim), jnp.bfloat16),                # M
            ]),
        compiler_params=pltpu.CompilerParams(
            dimension_semantics=("parallel", "arbitrary", "arbitrary"),
            vmem_limit_bytes=48 * 1024 * 1024),
    )(x_bf, wkv_t, wq_t, gk, bk, gv, bv, wo_h, bo)


# ----------------------------------------------------------------------------
# References for testing.  All host-side math stays in f32 dots (operands are
# merely *quantized* to bf16 where the kernel feeds the MXU), so no bf16 x
# bf16 dot is ever dispatched outside the Pallas kernel.
# ----------------------------------------------------------------------------
def _q(t):
    """Quantize to the bf16 grid but keep f32 storage/compute."""
    return t.astype(jnp.bfloat16).astype(jnp.float32)


def g_attention_reference(x, wqkv, gamma_k, beta_k, gamma_v, beta_v, wout, bout,
                          *, heads, dim_head, eps=1e-5):
    """Pure f32 transcription of the PyTorch G_Attention forward."""
    b, n, dim = x.shape
    inner = heads * dim_head
    qkv = x @ wqkv.T
    q, k, v = jnp.split(qkv, 3, axis=-1)

    def to_heads(t):
        return t.reshape(b, n, heads, dim_head).transpose(0, 2, 1, 3)
    q, k, v = map(to_heads, (q, k, v))                      # (b, h, n, d)

    def ln(t, g, bb):
        mu = t.mean(-1, keepdims=True)
        var = ((t - mu) ** 2).mean(-1, keepdims=True)
        return (t - mu) / jnp.sqrt(var + eps) * g[None, :, None, :] \
               + bb[None, :, None, :]

    k = ln(k, gamma_k, beta_k)
    v = ln(v, gamma_v, beta_v)
    scores = jnp.einsum('bhnd,bhne->bhde', k, v) / n
    out = jnp.einsum('bhnd,bhde->bhne', q, scores)
    out = out.transpose(0, 2, 1, 3).reshape(b, n, inner)
    return out @ wout.T + bout


def g_attention_mirror(x, wqkv, gamma_k, beta_k, gamma_v, beta_v, wout, bout,
                       *, heads, dim_head, eps=1e-5):
    """Mirrors the kernel's bf16-operand / f32-accumulate math using f32 dots
    only (bf16 values are exact in f32, MXU accumulates in f32)."""
    b, n, dim = x.shape
    inner = heads * dim_head
    d = dim_head
    wq, wk, wv = jnp.split(wqkv, 3, axis=0)
    wq_t = _q(wq.T)                                             # (dim, inner)
    wkv_t = _q(jnp.concatenate([wk, wv], axis=0).T)             # (dim, 2*inner)
    wo_h = _q(wout.T.reshape(heads, d, dim))                    # (h, d, dim)
    xb = _q(x)

    kv = jnp.einsum('bnd,df->bnf', xb, wkv_t)                   # f32
    k = kv[..., :inner].reshape(b, n, heads, d)
    v = kv[..., inner:].reshape(b, n, heads, d)

    def ln(t, g, bb):
        mu = t.mean(-1, keepdims=True)
        var = ((t - mu) ** 2).mean(-1, keepdims=True)
        return (t - mu) * lax.rsqrt(var + eps) * g[None, None] + bb[None, None]

    k = _q(ln(k, gamma_k, beta_k))
    v = _q(ln(v, gamma_v, beta_v))
    scores = jnp.einsum('bnhd,bnhe->bhde', k, v) / n            # f32 accum
    m = jnp.einsum('bhde,hef->bhdf', _q(scores), wo_h)          # (b,h,d,dim)
    m = _q(m.reshape(b, inner, dim))                            # M stored bf16
    q = _q(jnp.einsum('bnd,df->bnf', xb, wq_t))
    y = jnp.einsum('bnf,bfd->bnd', q, m)
    return y + bout


if __name__ == "__main__":
    B, N, DIM = 2, 16, 32
    HEADS, DIM_HEAD = 4, 16
    INNER = HEADS * DIM_HEAD

    key = jax.random.PRNGKey(0)
    ks = jax.random.split(key, 8)
    x = jax.random.normal(ks[0], (B, N, DIM), dtype=jnp.float32)
    wqkv = 0.1 * jax.random.normal(ks[1], (3 * INNER, DIM), dtype=jnp.float32)
    wout = 0.1 * jax.random.normal(ks[2], (DIM, INNER), dtype=jnp.float32)
    bout = 0.1 * jax.random.normal(ks[3], (DIM,), dtype=jnp.float32)
    gamma_k = 1.0 + 0.1 * jax.random.normal(ks[4], (HEADS, DIM_HEAD), jnp.float32)
    beta_k = 0.1 * jax.random.normal(ks[5], (HEADS, DIM_HEAD), jnp.float32)
    gamma_v = 1.0 + 0.1 * jax.random.normal(ks[6], (HEADS, DIM_HEAD), jnp.float32)
    beta_v = 0.1 * jax.random.normal(ks[7], (HEADS, DIM_HEAD), jnp.float32)

    # block_n=8 -> 2 n-tiles: exercises the two-phase score-accumulation path.
    out = g_attention(x, wqkv, gamma_k, beta_k, gamma_v, beta_v, wout, bout,
                      heads=HEADS, dim_head=DIM_HEAD, block_n=8)
    out = jax.block_until_ready(out)
    assert out.shape == (B, N, DIM)
    assert bool(jnp.all(jnp.isfinite(out)))

    # Tight check vs. an f32-dot transcription of the same quantization points.
    mirror = g_attention_mirror(x, wqkv, gamma_k, beta_k, gamma_v, beta_v,
                                wout, bout, heads=HEADS, dim_head=DIM_HEAD)
    err_m = float(jnp.max(jnp.abs(out - mirror)))
    assert jnp.allclose(out, mirror, atol=2e-3, rtol=2e-3), \
        f"mirror-path max abs err {err_m}"

    # Module-semantics check vs. pure f32 reference; tolerance covers bf16
    # operand quantization in the MXU path.
    ref = g_attention_reference(x, wqkv, gamma_k, beta_k, gamma_v, beta_v,
                                wout, bout, heads=HEADS, dim_head=DIM_HEAD)
    err_r = float(jnp.max(jnp.abs(out - ref)))
    assert jnp.allclose(out, ref, atol=7.5e-2, rtol=5e-2), \
        f"f32-reference max abs err {err_r}"

    print("KERNEL_OK")
</pallas_src>

<mosaic_0001>
module attributes {stable_mosaic.version = 11 : i64} {
  func.func @_g_attention_kernel(%arg0: i32, %arg1: i32, %arg2: i32, %arg3: memref<1x8x32xbf16, #tpu.memory_space<vmem>>, %arg4: memref<32x128xbf16, #tpu.memory_space<vmem>>, %arg5: memref<32x64xbf16, #tpu.memory_space<vmem>>, %arg6: memref<4x1x16xf32, #tpu.memory_space<vmem>>, %arg7: memref<4x1x16xf32, #tpu.memory_space<vmem>>, %arg8: memref<4x1x16xf32, #tpu.memory_space<vmem>>, %arg9: memref<4x1x16xf32, #tpu.memory_space<vmem>>, %arg10: memref<4x16x32xbf16, #tpu.memory_space<vmem>>, %arg11: memref<1x32xf32, #tpu.memory_space<vmem>>, %arg12: memref<1x8x32xf32, #tpu.memory_space<vmem>>, %arg13: memref<4x16x16xf32, #tpu.memory_space<vmem>>, %arg14: memref<64x32xbf16, #tpu.memory_space<vmem>>) attributes {dimension_semantics = [#tpu.dimension_semantics<parallel>, #tpu.dimension_semantics<arbitrary>, #tpu.dimension_semantics<arbitrary>], iteration_bounds = array<i64: 2, 2, 2>, scalar_prefetch = 0 : i64, scratch_operands = 2 : i64, tpu.core_type = #tpu.core_type<tc>, window_params = [{transform_indices = @transform_0, window_bounds = array<i64: 1, 8, 32>}, {pipeline_mode = #tpu.pipeline_mode<synchronous>, transform_indices = @transform_1, window_bounds = array<i64: 32, 128>}, {pipeline_mode = #tpu.pipeline_mode<synchronous>, transform_indices = @transform_2, window_bounds = array<i64: 32, 64>}, {pipeline_mode = #tpu.pipeline_mode<synchronous>, transform_indices = @transform_3, window_bounds = array<i64: 4, 1, 16>}, {pipeline_mode = #tpu.pipeline_mode<synchronous>, transform_indices = @transform_4, window_bounds = array<i64: 4, 1, 16>}, {pipeline_mode = #tpu.pipeline_mode<synchronous>, transform_indices = @transform_5, window_bounds = array<i64: 4, 1, 16>}, {pipeline_mode = #tpu.pipeline_mode<synchronous>, transform_indices = @transform_6, window_bounds = array<i64: 4, 1, 16>}, {pipeline_mode = #tpu.pipeline_mode<synchronous>, transform_indices = @transform_7, window_bounds = array<i64: 4, 16, 32>}, {pipeline_mode = #tpu.pipeline_mode<synchronous>, transform_indices = @transform_8, window_bounds = array<i64: 1, 32>}, {transform_indices = @transform_9, window_bounds = array<i64: 1, 8, 32>}]} {
    %c0_i32 = arith.constant 0 : i32
    %0 = arith.cmpi eq, %arg1, %c0_i32 : i32
    %1 = arith.extui %0 : i1 to i32
    %c0_i32_0 = arith.constant 0 : i32
    %2 = arith.cmpi ne, %1, %c0_i32_0 : i32
    scf.if %2 {
      %c0_i32_5 = arith.constant 0 : i32
      %11 = arith.cmpi eq, %arg2, %c0_i32_5 : i32
      %12 = arith.extui %11 : i1 to i32
      %c0_i32_6 = arith.constant 0 : i32
      %13 = arith.cmpi ne, %12, %c0_i32_6 : i32
      scf.if %13 {
        %cst_124 = arith.constant 0.000000e+00 : f32
        %270 = vector.broadcast %cst_124 : f32 to vector<4x16x16xf32>
        %c0_125 = arith.constant 0 : index
        %c0_126 = arith.constant 0 : index
        %c0_127 = arith.constant 0 : index
        %271 = vector.load %arg13[%c0_125, %c0_126, %c0_127] : memref<4x16x16xf32, #tpu.memory_space<vmem>>, vector<4x16x16xf32>
        tpu.vector_store %arg13[%c0_125, %c0_126, %c0_127], %270 {strides = array<i32>} : memref<4x16x16xf32, #tpu.memory_space<vmem>>, vector<4x16x16xf32>,
      } else {
      }
      %c0 = arith.constant 0 : index
      %c0_7 = arith.constant 0 : index
      %c0_8 = arith.constant 0 : index
      %14 = vector.load %arg3[%c0, %c0_7, %c0_8] : memref<1x8x32xbf16, #tpu.memory_space<vmem>>, vector<1x8x32xbf16>
      %15 = vector.shape_cast %14 : vector<1x8x32xbf16> to vector<8x32xbf16>
      %c0_9 = arith.constant 0 : index
      %c0_10 = arith.constant 0 : index
      %16 = vector.load %arg4[%c0_9, %c0_10] : memref<32x128xbf16, #tpu.memory_space<vmem>>, vector<32x128xbf16>
      %cst = arith.constant dense<0.000000e+00> : vector<8x128xf32>
      %17 = tpu.matmul %15, %16, %cst {dimension_numbers = #tpu.dot_dimension_numbers<[1], [0], [0], [1], [0, 0, 1, 1], [], []>} : vector<8x32xbf16>, vector<32x128xbf16>, vector<8x128xf32> -> vector<8x128xf32>
      %18 = vector.extract_strided_slice %17 {offsets = [0, 0], sizes = [8, 16], strides = [1, 1]} : vector<8x128xf32> to vector<8x16xf32>
      %c0_11 = arith.constant 0 : index
      %c0_12 = arith.constant 0 : index
      %c0_13 = arith.constant 0 : index
      %19 = vector.load %arg6[%c0_11, %c0_12, %c0_13] : memref<4x1x16xf32, #tpu.memory_space<vmem>>, vector<1x1x16xf32>
      %20 = vector.shape_cast %19 : vector<1x1x16xf32> to vector<1x16xf32>
      %c0_14 = arith.constant 0 : index
      %c0_15 = arith.constant 0 : index
      %c0_16 = arith.constant 0 : index
      %21 = vector.load %arg7[%c0_14, %c0_15, %c0_16] : memref<4x1x16xf32, #tpu.memory_space<vmem>>, vector<1x1x16xf32>
      %22 = vector.shape_cast %21 : vector<1x1x16xf32> to vector<1x16xf32>
      %cst_17 = arith.constant dense<0.000000e+00> : vector<8xf32>
      %23 = vector.multi_reduction <add>, %18, %cst_17 [1] : vector<8x16xf32> to vector<8xf32>
      %24 = vector.shape_cast %23 : vector<8xf32> to vector<8x1xf32>
      %cst_18 = arith.constant 1.600000e+01 : f32
      %25 = vector.broadcast %cst_18 : f32 to vector<8x1xf32>
      %26 = arith.divf %24, %25 : vector<8x1xf32>
      %27 = vector.broadcast %26 : vector<8x1xf32> to vector<8x16xf32>
      %28 = arith.subf %18, %27 : vector<8x16xf32>
      %29 = arith.mulf %28, %28 : vector<8x16xf32>
      %cst_19 = arith.constant dense<0.000000e+00> : vector<8xf32>
      %30 = vector.multi_reduction <add>, %29, %cst_19 [1] : vector<8x16xf32> to vector<8xf32>
      %31 = vector.shape_cast %30 : vector<8xf32> to vector<8x1xf32>
      %cst_20 = arith.constant 1.600000e+01 : f32
      %32 = vector.broadcast %cst_20 : f32 to vector<8x1xf32>
      %33 = arith.divf %31, %32 : vector<8x1xf32>
      %34 = vector.broadcast %26 : vector<8x1xf32> to vector<8x16xf32>
      %35 = arith.subf %18, %34 : vector<8x16xf32>
      %cst_21 = arith.constant 9.99999974E-6 : f32
      %36 = vector.broadcast %cst_21 : f32 to vector<8x1xf32>
      %37 = arith.addf %33, %36 : vector<8x1xf32>
      %38 = math.rsqrt %37 : vector<8x1xf32>
      %39 = vector.broadcast %38 : vector<8x1xf32> to vector<8x16xf32>
      %40 = arith.mulf %35, %39 : vector<8x16xf32>
      %41 = vector.broadcast %20 : vector<1x16xf32> to vector<8x16xf32>
      %42 = arith.mulf %40, %41 : vector<8x16xf32>
      %43 = vector.broadcast %22 : vector<1x16xf32> to vector<8x16xf32>
      %44 = arith.addf %42, %43 : vector<8x16xf32>
      %45 = vector.extract_strided_slice %17 {offsets = [0, 64], sizes = [8, 16], strides = [1, 1]} : vector<8x128xf32> to vector<8x16xf32>
      %c0_22 = arith.constant 0 : index
      %c0_23 = arith.constant 0 : index
      %c0_24 = arith.constant 0 : index
      %46 = vector.load %arg8[%c0_22, %c0_23, %c0_24] : memref<4x1x16xf32, #tpu.memory_space<vmem>>, vector<1x1x16xf32>
      %47 = vector.shape_cast %46 : vector<1x1x16xf32> to vector<1x16xf32>
      %c0_25 = arith.constant 0 : index
      %c0_26 = arith.constant 0 : index
      %c0_27 = arith.constant 0 : index
      %48 = vector.load %arg9[%c0_25, %c0_26, %c0_27] : memref<4x1x16xf32, #tpu.memory_space<vmem>>, vector<1x1x16xf32>
      %49 = vector.shape_cast %48 : vector<1x1x16xf32> to vector<1x16xf32>
      %cst_28 = arith.constant dense<0.000000e+00> : vector<8xf32>
      %50 = vector.multi_reduction <add>, %45, %cst_28 [1] : vector<8x16xf32> to vector<8xf32>
      %51 = vector.shape_cast %50 : vector<8xf32> to vector<8x1xf32>
      %cst_29 = arith.constant 1.600000e+01 : f32
      %52 = vector.broadcast %cst_29 : f32 to vector<8x1xf32>
      %53 = arith.divf %51, %52 : vector<8x1xf32>
      %54 = vector.broadcast %53 : vector<8x1xf32> to vector<8x16xf32>
      %55 = arith.subf %45, %54 : vector<8x16xf32>
      %56 = arith.mulf %55, %55 : vector<8x16xf32>
      %cst_30 = arith.constant dense<0.000000e+00> : vector<8xf32>
      %57 = vector.multi_reduction <add>, %56, %cst_30 [1] : vector<8x16xf32> to vector<8xf32>
      %58 = vector.shape_cast %57 : vector<8xf32> to vector<8x1xf32>
      %cst_31 = arith.constant 1.600000e+01 : f32
      %59 = vector.broadcast %cst_31 : f32 to vector<8x1xf32>
      %60 = arith.divf %58, %59 : vector<8x1xf32>
      %61 = vector.broadcast %53 : vector<8x1xf32> to vector<8x16xf32>
      %62 = arith.subf %45, %61 : vector<8x16xf32>
      %cst_32 = arith.constant 9.99999974E-6 : f32
      %63 = vector.broadcast %cst_32 : f32 to vector<8x1xf32>
      %64 = arith.addf %60, %63 : vector<8x1xf32>
      %65 = math.rsqrt %64 : vector<8x1xf32>
      %66 = vector.broadcast %65 : vector<8x1xf32> to vector<8x16xf32>
      %67 = arith.mulf %62, %66 : vector<8x16xf32>
      %68 = vector.broadcast %47 : vector<1x16xf32> to vector<8x16xf32>
      %69 = arith.mulf %67, %68 : vector<8x16xf32>
      %70 = vector.broadcast %49 : vector<1x16xf32> to vector<8x16xf32>
      %71 = arith.addf %69, %70 : vector<8x16xf32>
      %c0_33 = arith.constant 0 : index
      %c0_34 = arith.constant 0 : index
      %c0_35 = arith.constant 0 : index
      %72 = vector.load %arg13[%c0_33, %c0_34, %c0_35] : memref<4x16x16xf32, #tpu.memory_space<vmem>>, vector<1x16x16xf32>
      %73 = vector.shape_cast %72 : vector<1x16x16xf32> to vector<16x16xf32>
      %74 = arith.truncf %44 : vector<8x16xf32> to vector<8x16xbf16>
      %75 = arith.truncf %71 : vector<8x16xf32> to vector<8x16xbf16>
      %cst_36 = arith.constant dense<0.000000e+00> : vector<16x16xf32>
      %76 = tpu.matmul %74, %75, %cst_36 {dimension_numbers = #tpu.dot_dimension_numbers<[0], [0], [1], [1], [0, 1, 1, 1], [], []>} : vector<8x16xbf16>, vector<8x16xbf16>, vector<16x16xf32> -> vector<16x16xf32>
      %77 = arith.addf %73, %76 : vector<16x16xf32>
      %c0_37 = arith.constant 0 : index
      %c0_38 = arith.constant 0 : index
      %c0_39 = arith.constant 0 : index
      %78 = vector.load %arg13[%c0_37, %c0_38, %c0_39] : memref<4x16x16xf32, #tpu.memory_space<vmem>>, vector<1x16x16xf32>
      %79 = vector.shape_cast %78 : vector<1x16x16xf32> to vector<16x16xf32>
      %80 = vector.shape_cast %77 : vector<16x16xf32> to vector<1x16x16xf32>
      tpu.vector_store %arg13[%c0_37, %c0_38, %c0_39], %80 {strides = array<i32>} : memref<4x16x16xf32, #tpu.memory_space<vmem>>, vector<1x16x16xf32>,
      %81 = vector.extract_strided_slice %17 {offsets = [0, 16], sizes = [8, 16], strides = [1, 1]} : vector<8x128xf32> to vector<8x16xf32>
      %c1 = arith.constant 1 : index
      %c0_40 = arith.constant 0 : index
      %c0_41 = arith.constant 0 : index
      %82 = vector.load %arg6[%c1, %c0_40, %c0_41] : memref<4x1x16xf32, #tpu.memory_space<vmem>>, vector<1x1x16xf32>
      %83 = vector.shape_cast %82 : vector<1x1x16xf32> to vector<1x16xf32>
      %c1_42 = arith.constant 1 : index
      %c0_43 = arith.constant 0 : index
      %c0_44 = arith.constant 0 : index
      %84 = vector.load %arg7[%c1_42, %c0_43, %c0_44] : memref<4x1x16xf32, #tpu.memory_space<vmem>>, vector<1x1x16xf32>
      %85 = vector.shape_cast %84 : vector<1x1x16xf32> to vector<1x16xf32>
      %cst_45 = arith.constant dense<0.000000e+00> : vector<8xf32>
      %86 = vector.multi_reduction <add>, %81, %cst_45 [1] : vector<8x16xf32> to vector<8xf32>
      %87 = vector.shape_cast %86 : vector<8xf32> to vector<8x1xf32>
      %cst_46 = arith.constant 1.600000e+01 : f32
      %88 = vector.broadcast %cst_46 : f32 to vector<8x1xf32>
      %89 = arith.divf %87, %88 : vector<8x1xf32>
      %90 = vector.broadcast %89 : vector<8x1xf32> to vector<8x16xf32>
      %91 = arith.subf %81, %90 : vector<8x16xf32>
      %92 = arith.mulf %91, %91 : vector<8x16xf32>
      %cst_47 = arith.constant dense<0.000000e+00> : vector<8xf32>
      %93 = vector.multi_reduction <add>, %92, %cst_47 [1] : vector<8x16xf32> to vector<8xf32>
      %94 = vector.shape_cast %93 : vector<8xf32> to vector<8x1xf32>
      %cst_48 = arith.constant 1.600000e+01 : f32
      %95 = vector.broadcast %cst_48 : f32 to vector<8x1xf32>
      %96 = arith.divf %94, %95 : vector<8x1xf32>
      %97 = vector.broadcast %89 : vector<8x1xf32> to vector<8x16xf32>
      %98 = arith.subf %81, %97 : vector<8x16xf32>
      %cst_49 = arith.constant 9.99999974E-6 : f32
      %99 = vector.broadcast %cst_49 : f32 to vector<8x1xf32>
      %100 = arith.addf %96, %99 : vector<8x1xf32>
      %101 = math.rsqrt %100 : vector<8x1xf32>
      %102 = vector.broadcast %101 : vector<8x1xf32> to vector<8x16xf32>
      %103 = arith.mulf %98, %102 : vector<8x16xf32>
      %104 = vector.broadcast %83 : vector<1x16xf32> to vector<8x16xf32>
      %105 = arith.mulf %103, %104 : vector<8x16xf32>
      %106 = vector.broadcast %85 : vector<1x16xf32> to vector<8x16xf32>
      %107 = arith.addf %105, %106 : vector<8x16xf32>
      %108 = vector.extract_strided_slice %17 {offsets = [0, 80], sizes = [8, 16], strides = [1, 1]} : vector<8x128xf32> to vector<8x16xf32>
      %c1_50 = arith.constant 1 : index
      %c0_51 = arith.constant 0 : index
      %c0_52 = arith.constant 0 : index
      %109 = vector.load %arg8[%c1_50, %c0_51, %c0_52] : memref<4x1x16xf32, #tpu.memory_space<vmem>>, vector<1x1x16xf32>
      %110 = vector.shape_cast %109 : vector<1x1x16xf32> to vector<1x16xf32>
      %c1_53 = arith.constant 1 : index
      %c0_54 = arith.constant 0 : index
      %c0_55 = arith.constant 0 : index
      %111 = vector.load %arg9[%c1_53, %c0_54, %c0_55] : memref<4x1x16xf32, #tpu.memory_space<vmem>>, vector<1x1x16xf32>
      %112 = vector.shape_cast %111 : vector<1x1x16xf32> to vector<1x16xf32>
      %cst_56 = arith.constant dense<0.000000e+00> : vector<8xf32>
      %113 = vector.multi_reduction <add>, %108, %cst_56 [1] : vector<8x16xf32> to vector<8xf32>
      %114 = vector.shape_cast %113 : vector<8xf32> to vector<8x1xf32>
      %cst_57 = arith.constant 1.600000e+01 : f32
      %115 = vector.broadcast %cst_57 : f32 to vector<8x1xf32>
      %116 = arith.divf %114, %115 : vector<8x1xf32>
      %117 = vector.broadcast %116 : vector<8x1xf32> to vector<8x16xf32>
      %118 = arith.subf %108, %117 : vector<8x16xf32>
      %119 = arith.mulf %118, %118 : vector<8x16xf32>
      %cst_58 = arith.constant dense<0.000000e+00> : vector<8xf32>
      %120 = vector.multi_reduction <add>, %119, %cst_58 [1] : vector<8x16xf32> to vector<8xf32>
      %121 = vector.shape_cast %120 : vector<8xf32> to vector<8x1xf32>
      %cst_59 = arith.constant 1.600000e+01 : f32
      %122 = vector.broadcast %cst_59 : f32 to vector<8x1xf32>
      %123 = arith.divf %121, %122 : vector<8x1xf32>
      %124 = vector.broadcast %116 : vector<8x1xf32> to vector<8x16xf32>
      %125 = arith.subf %108, %124 : vector<8x16xf32>
      %cst_60 = arith.constant 9.99999974E-6 : f32
      %126 = vector.broadcast %cst_60 : f32 to vector<8x1xf32>
      %127 = arith.addf %123, %126 : vector<8x1xf32>
      %128 = math.rsqrt %127 : vector<8x1xf32>
      %129 = vector.broadcast %128 : vector<8x1xf32> to vector<8x16xf32>
      %130 = arith.mulf %125, %129 : vector<8x16xf32>
      %131 = vector.broadcast %110 : vector<1x16xf32> to vector<8x16xf32>
      %132 = arith.mulf %130, %131 : vector<8x16xf32>
      %133 = vector.broadcast %112 : vector<1x16xf32> to vector<8x16xf32>
      %134 = arith.addf %132, %133 : vector<8x16xf32>
      %c1_61 = arith.constant 1 : index
      %c0_62 = arith.constant 0 : index
      %c0_63 = arith.constant 0 : index
      %135 = vector.load %arg13[%c1_61, %c0_62, %c0_63] : memref<4x16x16xf32, #tpu.memory_space<vmem>>, vector<1x16x16xf32>
      %136 = vector.shape_cast %135 : vector<1x16x16xf32> to vector<16x16xf32>
      %137 = arith.truncf %107 : vector<8x16xf32> to vector<8x16xbf16>
      %138 = arith.truncf %134 : vector<8x16xf32> to vector<8x16xbf16>
      %cst_64 = arith.constant dense<0.000000e+00> : vector<16x16xf32>
      %139 = tpu.matmul %137, %138, %cst_64 {dimension_numbers = #tpu.dot_dimension_numbers<[0], [0], [1], [1], [0, 1, 1, 1], [], []>} : vector<8x16xbf16>, vector<8x16xbf16>, vector<16x16xf32> -> vector<16x16xf32>
      %140 = arith.addf %136, %139 : vector<16x16xf32>
      %c1_65 = arith.constant 1 : index
      %c0_66 = arith.constant 0 : index
      %c0_67 = arith.constant 0 : index
      %141 = vector.load %arg13[%c1_65, %c0_66, %c0_67] : memref<4x16x16xf32, #tpu.memory_space<vmem>>, vector<1x16x16xf32>
      %142 = vector.shape_cast %141 : vector<1x16x16xf32> to vector<16x16xf32>
      %143 = vector.shape_cast %140 : vector<16x16xf32> to vector<1x16x16xf32>
      tpu.vector_store %arg13[%c1_65, %c0_66, %c0_67], %143 {strides = array<i32>} : memref<4x16x16xf32, #tpu.memory_space<vmem>>, vector<1x16x16xf32>,
      %144 = vector.extract_strided_slice %17 {offsets = [0, 32], sizes = [8, 16], strides = [1, 1]} : vector<8x128xf32> to vector<8x16xf32>
      %c2 = arith.constant 2 : index
      %c0_68 = arith.constant 0 : index
      %c0_69 = arith.constant 0 : index
      %145 = vector.load %arg6[%c2, %c0_68, %c0_69] : memref<4x1x16xf32, #tpu.memory_space<vmem>>, vector<1x1x16xf32>
      %146 = vector.shape_cast %145 : vector<1x1x16xf32> to vector<1x16xf32>
      %c2_70 = arith.constant 2 : index
      %c0_71 = arith.constant 0 : index
      %c0_72 = arith.constant 0 : index
      %147 = vector.load %arg7[%c2_70, %c0_71, %c0_72] : memref<4x1x16xf32, #tpu.memory_space<vmem>>, vector<1x1x16xf32>
      %148 = vector.shape_cast %147 : vector<1x1x16xf32> to vector<1x16xf32>
      %cst_73 = arith.constant dense<0.000000e+00> : vector<8xf32>
      %149 = vector.multi_reduction <add>, %144, %cst_73 [1] : vector<8x16xf32> to vector<8xf32>
      %150 = vector.shape_cast %149 : vector<8xf32> to vector<8x1xf32>
      %cst_74 = arith.constant 1.600000e+01 : f32
      %151 = vector.broadcast %cst_74 : f32 to vector<8x1xf32>
      %152 = arith.divf %150, %151 : vector<8x1xf32>
      %153 = vector.broadcast %152 : vector<8x1xf32> to vector<8x16xf32>
      %154 = arith.subf %144, %153 : vector<8x16xf32>
      %155 = arith.mulf %154, %154 : vector<8x16xf32>
      %cst_75 = arith.constant dense<0.000000e+00> : vector<8xf32>
      %156 = vector.multi_reduction <add>, %155, %cst_75 [1] : vector<8x16xf32> to vector<8xf32>
      %157 = vector.shape_cast %156 : vector<8xf32> to vector<8x1xf32>
      %cst_76 = arith.constant 1.600000e+01 : f32
      %158 = vector.broadcast %cst_76 : f32 to vector<8x1xf32>
      %159 = arith.divf %157, %158 : vector<8x1xf32>
      %160 = vector.broadcast %152 : vector<8x1xf32> to vector<8x16xf32>
      %161 = arith.subf %144, %160 : vector<8x16xf32>
      %cst_77 = arith.constant 9.99999974E-6 : f32
      %162 = vector.broadcast %cst_77 : f32 to vector<8x1xf32>
      %163 = arith.addf %159, %162 : vector<8x1xf32>
      %164 = math.rsqrt %163 : vector<8x1xf32>
      %165 = vector.broadcast %164 : vector<8x1xf32> to vector<8x16xf32>
      %166 = arith.mulf %161, %165 : vector<8x16xf32>
      %167 = vector.broadcast %146 : vector<1x16xf32> to vector<8x16xf32>
      %168 = arith.mulf %166, %167 : vector<8x16xf32>
      %169 = vector.broadcast %148 : vector<1x16xf32> to vector<8x16xf32>
      %170 = arith.addf %168, %169 : vector<8x16xf32>
      %171 = vector.extract_strided_slice %17 {offsets = [0, 96], sizes = [8, 16], strides = [1, 1]} : vector<8x128xf32> to vector<8x16xf32>
      %c2_78 = arith.constant 2 : index
      %c0_79 = arith.constant 0 : index
      %c0_80 = arith.constant 0 : index
      %172 = vector.load %arg8[%c2_78, %c0_79, %c0_80] : memref<4x1x16xf32, #tpu.memory_space<vmem>>, vector<1x1x16xf32>
      %173 = vector.shape_cast %172 : vector<1x1x16xf32> to vector<1x16xf32>
      %c2_81 = arith.constant 2 : index
      %c0_82 = arith.constant 0 : index
      %c0_83 = arith.constant 0 : index
      %174 = vector.load %arg9[%c2_81, %c0_82, %c0_83] : memref<4x1x16xf32, #tpu.memory_space<vmem>>, vector<1x1x16xf32>
      %175 = vector.shape_cast %174 : vector<1x1x16xf32> to vector<1x16xf32>
      %cst_84 = arith.constant dense<0.000000e+00> : vector<8xf32>
      %176 = vector.multi_reduction <add>, %171, %cst_84 [1] : vector<8x16xf32> to vector<8xf32>
      %177 = vector.shape_cast %176 : vector<8xf32> to vector<8x1xf32>
      %cst_85 = arith.constant 1.600000e+01 : f32
      %178 = vector.broadcast %cst_85 : f32 to vector<8x1xf32>
      %179 = arith.divf %177, %178 : vector<8x1xf32>
      %180 = vector.broadcast %179 : vector<8x1xf32> to vector<8x16xf32>
      %181 = arith.subf %171, %180 : vector<8x16xf32>
      %182 = arith.mulf %181, %181 : vector<8x16xf32>
      %cst_86 = arith.constant dense<0.000000e+00> : vector<8xf32>
      %183 = vector.multi_reduction <add>, %182, %cst_86 [1] : vector<8x16xf32> to vector<8xf32>
      %184 = vector.shape_cast %183 : vector<8xf32> to vector<8x1xf32>
      %cst_87 = arith.constant 1.600000e+01 : f32
      %185 = vector.broadcast %cst_87 : f32 to vector<8x1xf32>
      %186 = arith.divf %184, %185 : vector<8x1xf32>
      %187 = vector.broadcast %179 : vector<8x1xf32> to vector<8x16xf32>
      %188 = arith.subf %171, %187 : vector<8x16xf32>
      %cst_88 = arith.constant 9.99999974E-6 : f32
      %189 = vector.broadcast %cst_88 : f32 to vector<8x1xf32>
      %190 = arith.addf %186, %189 : vector<8x1xf32>
      %191 = math.rsqrt %190 : vector<8x1xf32>
      %192 = vector.broadcast %191 : vector<8x1xf32> to vector<8x16xf32>
      %193 = arith.mulf %188, %192 : vector<8x16xf32>
      %194 = vector.broadcast %173 : vector<1x16xf32> to vector<8x16xf32>
      %195 = arith.mulf %193, %194 : vector<8x16xf32>
      %196 = vector.broadcast %175 : vector<1x16xf32> to vector<8x16xf32>
      %197 = arith.addf %195, %196 : vector<8x16xf32>
      %c2_89 = arith.constant 2 : index
      %c0_90 = arith.constant 0 : index
      %c0_91 = arith.constant 0 : index
      %198 = vector.load %arg13[%c2_89, %c0_90, %c0_91] : memref<4x16x16xf32, #tpu.memory_space<vmem>>, vector<1x16x16xf32>
      %199 = vector.shape_cast %198 : vector<1x16x16xf32> to vector<16x16xf32>
      %200 = arith.truncf %170 : vector<8x16xf32> to vector<8x16xbf16>
      %201 = arith.truncf %197 : vector<8x16xf32> to vector<8x16xbf16>
      %cst_92 = arith.constant dense<0.000000e+00> : vector<16x16xf32>
      %202 = tpu.matmul %200, %201, %cst_92 {dimension_numbers = #tpu.dot_dimension_numbers<[0], [0], [1], [1], [0, 1, 1, 1], [], []>} : vector<8x16xbf16>, vector<8x16xbf16>, vector<16x16xf32> -> vector<16x16xf32>
      %203 = arith.addf %199, %202 : vector<16x16xf32>
      %c2_93 = arith.constant 2 : index
      %c0_94 = arith.constant 0 : index
      %c0_95 = arith.constant 0 : index
      %204 = vector.load %arg13[%c2_93, %c0_94, %c0_95] : memref<4x16x16xf32, #tpu.memory_space<vmem>>, vector<1x16x16xf32>
      %205 = vector.shape_cast %204 : vector<1x16x16xf32> to vector<16x16xf32>
      %206 = vector.shape_cast %203 : vector<16x16xf32> to vector<1x16x16xf32>
      tpu.vector_store %arg13[%c2_93, %c0_94, %c0_95], %206 {strides = array<i32>} : memref<4x16x16xf32, #tpu.memory_space<vmem>>, vector<1x16x16xf32>,
      %207 = vector.extract_strided_slice %17 {offsets = [0, 48], sizes = [8, 16], strides = [1, 1]} : vector<8x128xf32> to vector<8x16xf32>
      %c3 = arith.constant 3 : index
      %c0_96 = arith.constant 0 : index
      %c0_97 = arith.constant 0 : index
      %208 = vector.load %arg6[%c3, %c0_96, %c0_97] : memref<4x1x16xf32, #tpu.memory_space<vmem>>, vector<1x1x16xf32>
      %209 = vector.shape_cast %208 : vector<1x1x16xf32> to vector<1x16xf32>
      %c3_98 = arith.constant 3 : index
      %c0_99 = arith.constant 0 : index
      %c0_100 = arith.constant 0 : index
      %210 = vector.load %arg7[%c3_98, %c0_99, %c0_100] : memref<4x1x16xf32, #tpu.memory_space<vmem>>, vector<1x1x16xf32>
      %211 = vector.shape_cast %210 : vector<1x1x16xf32> to vector<1x16xf32>
      %cst_101 = arith.constant dense<0.000000e+00> : vector<8xf32>
      %212 = vector.multi_reduction <add>, %207, %cst_101 [1] : vector<8x16xf32> to vector<8xf32>
      %213 = vector.shape_cast %212 : vector<8xf32> to vector<8x1xf32>
      %cst_102 = arith.constant 1.600000e+01 : f32
      %214 = vector.broadcast %cst_102 : f32 to vector<8x1xf32>
      %215 = arith.divf %213, %214 : vector<8x1xf32>
      %216 = vector.broadcast %215 : vector<8x1xf32> to vector<8x16xf32>
      %217 = arith.subf %207, %216 : vector<8x16xf32>
      %218 = arith.mulf %217, %217 : vector<8x16xf32>
      %cst_103 = arith.constant dense<0.000000e+00> : vector<8xf32>
      %219 = vector.multi_reduction <add>, %218, %cst_103 [1] : vector<8x16xf32> to vector<8xf32>
      %220 = vector.shape_cast %219 : vector<8xf32> to vector<8x1xf32>
      %cst_104 = arith.constant 1.600000e+01 : f32
      %221 = vector.broadcast %cst_104 : f32 to vector<8x1xf32>
      %222 = arith.divf %220, %221 : vector<8x1xf32>
      %223 = vector.broadcast %215 : vector<8x1xf32> to vector<8x16xf32>
      %224 = arith.subf %207, %223 : vector<8x16xf32>
      %cst_105 = arith.constant 9.99999974E-6 : f32
      %225 = vector.broadcast %cst_105 : f32 to vector<8x1xf32>
      %226 = arith.addf %222, %225 : vector<8x1xf32>
      %227 = math.rsqrt %226 : vector<8x1xf32>
      %228 = vector.broadcast %227 : vector<8x1xf32> to vector<8x16xf32>
      %229 = arith.mulf %224, %228 : vector<8x16xf32>
      %230 = vector.broadcast %209 : vector<1x16xf32> to vector<8x16xf32>
      %231 = arith.mulf %229, %230 : vector<8x16xf32>
      %232 = vector.broadcast %211 : vector<1x16xf32> to vector<8x16xf32>
      %233 = arith.addf %231, %232 : vector<8x16xf32>
      %234 = vector.extract_strided_slice %17 {offsets = [0, 112], sizes = [8, 16], strides = [1, 1]} : vector<8x128xf32> to vector<8x16xf32>
      %c3_106 = arith.constant 3 : index
      %c0_107 = arith.constant 0 : index
      %c0_108 = arith.constant 0 : index
      %235 = vector.load %arg8[%c3_106, %c0_107, %c0_108] : memref<4x1x16xf32, #tpu.memory_space<vmem>>, vector<1x1x16xf32>
      %236 = vector.shape_cast %235 : vector<1x1x16xf32> to vector<1x16xf32>
      %c3_109 = arith.constant 3 : index
      %c0_110 = arith.constant 0 : index
      %c0_111 = arith.constant 0 : index
      %237 = vector.load %arg9[%c3_109, %c0_110, %c0_111] : memref<4x1x16xf32, #tpu.memory_space<vmem>>, vector<1x1x16xf32>
      %238 = vector.shape_cast %237 : vector<1x1x16xf32> to vector<1x16xf32>
      %cst_112 = arith.constant dense<0.000000e+00> : vector<8xf32>
      %239 = vector.multi_reduction <add>, %234, %cst_112 [1] : vector<8x16xf32> to vector<8xf32>
      %240 = vector.shape_cast %239 : vector<8xf32> to vector<8x1xf32>
      %cst_113 = arith.constant 1.600000e+01 : f32
      %241 = vector.broadcast %cst_113 : f32 to vector<8x1xf32>
      %242 = arith.divf %240, %241 : vector<8x1xf32>
      %243 = vector.broadcast %242 : vector<8x1xf32> to vector<8x16xf32>
      %244 = arith.subf %234, %243 : vector<8x16xf32>
      %245 = arith.mulf %244, %244 : vector<8x16xf32>
      %cst_114 = arith.constant dense<0.000000e+00> : vector<8xf32>
      %246 = vector.multi_reduction <add>, %245, %cst_114 [1] : vector<8x16xf32> to vector<8xf32>
      %247 = vector.shape_cast %246 : vector<8xf32> to vector<8x1xf32>
      %cst_115 = arith.constant 1.600000e+01 : f32
      %248 = vector.broadcast %cst_115 : f32 to vector<8x1xf32>
      %249 = arith.divf %247, %248 : vector<8x1xf32>
      %250 = vector.broadcast %242 : vector<8x1xf32> to vector<8x16xf32>
      %251 = arith.subf %234, %250 : vector<8x16xf32>
      %cst_116 = arith.constant 9.99999974E-6 : f32
      %252 = vector.broadcast %cst_116 : f32 to vector<8x1xf32>
      %253 = arith.addf %249, %252 : vector<8x1xf32>
      %254 = math.rsqrt %253 : vector<8x1xf32>
      %255 = vector.broadcast %254 : vector<8x1xf32> to vector<8x16xf32>
      %256 = arith.mulf %251, %255 : vector<8x16xf32>
      %257 = vector.broadcast %236 : vector<1x16xf32> to vector<8x16xf32>
      %258 = arith.mulf %256, %257 : vector<8x16xf32>
      %259 = vector.broadcast %238 : vector<1x16xf32> to vector<8x16xf32>
      %260 = arith.addf %258, %259 : vector<8x16xf32>
      %c3_117 = arith.constant 3 : index
      %c0_118 = arith.constant 0 : index
      %c0_119 = arith.constant 0 : index
      %261 = vector.load %arg13[%c3_117, %c0_118, %c0_119] : memref<4x16x16xf32, #tpu.memory_space<vmem>>, vector<1x16x16xf32>
      %262 = vector.shape_cast %261 : vector<1x16x16xf32> to vector<16x16xf32>
      %263 = arith.truncf %233 : vector<8x16xf32> to vector<8x16xbf16>
      %264 = arith.truncf %260 : vector<8x16xf32> to vector<8x16xbf16>
      %cst_120 = arith.constant dense<0.000000e+00> : vector<16x16xf32>
      %265 = tpu.matmul %263, %264, %cst_120 {dimension_numbers = #tpu.dot_dimension_numbers<[0], [0], [1], [1], [0, 1, 1, 1], [], []>} : vector<8x16xbf16>, vector<8x16xbf16>, vector<16x16xf32> -> vector<16x16xf32>
      %266 = arith.addf %262, %265 : vector<16x16xf32>
      %c3_121 = arith.constant 3 : index
      %c0_122 = arith.constant 0 : index
      %c0_123 = arith.constant 0 : index
      %267 = vector.load %arg13[%c3_121, %c0_122, %c0_123] : memref<4x16x16xf32, #tpu.memory_space<vmem>>, vector<1x16x16xf32>
      %268 = vector.shape_cast %267 : vector<1x16x16xf32> to vector<16x16xf32>
      %269 = vector.shape_cast %266 : vector<16x16xf32> to vector<1x16x16xf32>
      tpu.vector_store %arg13[%c3_121, %c0_122, %c0_123], %269 {strides = array<i32>} : memref<4x16x16xf32, #tpu.memory_space<vmem>>, vector<1x16x16xf32>,
    } else {
    }
    %c1_i32 = arith.constant 1 : i32
    %3 = arith.cmpi eq, %arg1, %c1_i32 : i32
    %c0_i32_1 = arith.constant 0 : i32
    %4 = arith.cmpi eq, %arg2, %c0_i32_1 : i32
    %5 = arith.andi %3, %4 : i1
    %6 = arith.extui %5 : i1 to i32
    %c0_i32_2 = arith.constant 0 : i32
    %7 = arith.cmpi ne, %6, %c0_i32_2 : i32
    scf.if %7 {
      %c0 = arith.constant 0 : index
      %c0_5 = arith.constant 0 : index
      %c0_6 = arith.constant 0 : index
      %11 = vector.load %arg13[%c0, %c0_5, %c0_6] : memref<4x16x16xf32, #tpu.memory_space<vmem>>, vector<1x16x16xf32>
      %12 = vector.shape_cast %11 : vector<1x16x16xf32> to vector<16x16xf32>
      %cst = arith.constant 6.250000e-02 : f32
      %13 = vector.broadcast %cst : f32 to vector<16x16xf32>
      %14 = arith.mulf %12, %13 : vector<16x16xf32>
      %15 = arith.truncf %14 : vector<16x16xf32> to vector<16x16xbf16>
      %c0_7 = arith.constant 0 : index
      %c0_8 = arith.constant 0 : index
      %c0_9 = arith.constant 0 : index
      %16 = vector.load %arg10[%c0_7, %c0_8, %c0_9] : memref<4x16x32xbf16, #tpu.memory_space<vmem>>, vector<1x16x32xbf16>
      %17 = vector.shape_cast %16 : vector<1x16x32xbf16> to vector<16x32xbf16>
      %cst_10 = arith.constant dense<0.000000e+00> : vector<16x32xf32>
      %18 = tpu.matmul %15, %17, %cst_10 {dimension_numbers = #tpu.dot_dimension_numbers<[1], [0], [0], [1], [0, 0, 1, 1], [], []>} : vector<16x16xbf16>, vector<16x32xbf16>, vector<16x32xf32> -> vector<16x32xf32>
      %19 = arith.truncf %18 : vector<16x32xf32> to vector<16x32xbf16>
      %c0_11 = arith.constant 0 : index
      %c0_12 = arith.constant 0 : index
      %20 = vector.load %arg14[%c0_11, %c0_12] : memref<64x32xbf16, #tpu.memory_space<vmem>>, vector<16x32xbf16>
      tpu.vector_store %arg14[%c0_11, %c0_12], %19 {strides = array<i32>} : memref<64x32xbf16, #tpu.memory_space<vmem>>, vector<16x32xbf16>,
      %c1 = arith.constant 1 : index
      %c0_13 = arith.constant 0 : index
      %c0_14 = arith.constant 0 : index
      %21 = vector.load %arg13[%c1, %c0_13, %c0_14] : memref<4x16x16xf32, #tpu.memory_space<vmem>>, vector<1x16x16xf32>
      %22 = vector.shape_cast %21 : vector<1x16x16xf32> to vector<16x16xf32>
      %cst_15 = arith.constant 6.250000e-02 : f32
      %23 = vector.broadcast %cst_15 : f32 to vector<16x16xf32>
      %24 = arith.mulf %22, %23 : vector<16x16xf32>
      %25 = arith.truncf %24 : vector<16x16xf32> to vector<16x16xbf16>
      %c1_16 = arith.constant 1 : index
      %c0_17 = arith.constant 0 : index
      %c0_18 = arith.constant 0 : index
      %26 = vector.load %arg10[%c1_16, %c0_17, %c0_18] : memref<4x16x32xbf16, #tpu.memory_space<vmem>>, vector<1x16x32xbf16>
      %27 = vector.shape_cast %26 : vector<1x16x32xbf16> to vector<16x32xbf16>
      %cst_19 = arith.constant dense<0.000000e+00> : vector<16x32xf32>
      %28 = tpu.matmul %25, %27, %cst_19 {dimension_numbers = #tpu.dot_dimension_numbers<[1], [0], [0], [1], [0, 0, 1, 1], [], []>} : vector<16x16xbf16>, vector<16x32xbf16>, vector<16x32xf32> -> vector<16x32xf32>
      %29 = arith.truncf %28 : vector<16x32xf32> to vector<16x32xbf16>
      %c16 = arith.constant 16 : index
      %c0_20 = arith.constant 0 : index
      %30 = vector.load %arg14[%c16, %c0_20] : memref<64x32xbf16, #tpu.memory_space<vmem>>, vector<16x32xbf16>
      tpu.vector_store %arg14[%c16, %c0_20], %29 {strides = array<i32>} : memref<64x32xbf16, #tpu.memory_space<vmem>>, vector<16x32xbf16>,
      %c2 = arith.constant 2 : index
      %c0_21 = arith.constant 0 : index
      %c0_22 = arith.constant 0 : index
      %31 = vector.load %arg13[%c2, %c0_21, %c0_22] : memref<4x16x16xf32, #tpu.memory_space<vmem>>, vector<1x16x16xf32>
      %32 = vector.shape_cast %31 : vector<1x16x16xf32> to vector<16x16xf32>
      %cst_23 = arith.constant 6.250000e-02 : f32
      %33 = vector.broadcast %cst_23 : f32 to vector<16x16xf32>
      %34 = arith.mulf %32, %33 : vector<16x16xf32>
      %35 = arith.truncf %34 : vector<16x16xf32> to vector<16x16xbf16>
      %c2_24 = arith.constant 2 : index
      %c0_25 = arith.constant 0 : index
      %c0_26 = arith.constant 0 : index
      %36 = vector.load %arg10[%c2_24, %c0_25, %c0_26] : memref<4x16x32xbf16, #tpu.memory_space<vmem>>, vector<1x16x32xbf16>
      %37 = vector.shape_cast %36 : vector<1x16x32xbf16> to vector<16x32xbf16>
      %cst_27 = arith.constant dense<0.000000e+00> : vector<16x32xf32>
      %38 = tpu.matmul %35, %37, %cst_27 {dimension_numbers = #tpu.dot_dimension_numbers<[1], [0], [0], [1], [0, 0, 1, 1], [], []>} : vector<16x16xbf16>, vector<16x32xbf16>, vector<16x32xf32> -> vector<16x32xf32>
      %39 = arith.truncf %38 : vector<16x32xf32> to vector<16x32xbf16>
      %c32 = arith.constant 32 : index
      %c0_28 = arith.constant 0 : index
      %40 = vector.load %arg14[%c32, %c0_28] : memref<64x32xbf16, #tpu.memory_space<vmem>>, vector<16x32xbf16>
      tpu.vector_store %arg14[%c32, %c0_28], %39 {strides = array<i32>} : memref<64x32xbf16, #tpu.memory_space<vmem>>, vector<16x32xbf16>,
      %c3 = arith.constant 3 : index
      %c0_29 = arith.constant 0 : index
      %c0_30 = arith.constant 0 : index
      %41 = vector.load %arg13[%c3, %c0_29, %c0_30] : memref<4x16x16xf32, #tpu.memory_space<vmem>>, vector<1x16x16xf32>
      %42 = vector.shape_cast %41 : vector<1x16x16xf32> to vector<16x16xf32>
      %cst_31 = arith.constant 6.250000e-02 : f32
      %43 = vector.broadcast %cst_31 : f32 to vector<16x16xf32>
      %44 = arith.mulf %42, %43 : vector<16x16xf32>
      %45 = arith.truncf %44 : vector<16x16xf32> to vector<16x16xbf16>
      %c3_32 = arith.constant 3 : index
      %c0_33 = arith.constant 0 : index
      %c0_34 = arith.constant 0 : index
      %46 = vector.load %arg10[%c3_32, %c0_33, %c0_34] : memref<4x16x32xbf16, #tpu.memory_space<vmem>>, vector<1x16x32xbf16>
      %47 = vector.shape_cast %46 : vector<1x16x32xbf16> to vector<16x32xbf16>
      %cst_35 = arith.constant dense<0.000000e+00> : vector<16x32xf32>
      %48 = tpu.matmul %45, %47, %cst_35 {dimension_numbers = #tpu.dot_dimension_numbers<[1], [0], [0], [1], [0, 0, 1, 1], [], []>} : vector<16x16xbf16>, vector<16x32xbf16>, vector<16x32xf32> -> vector<16x32xf32>
      %49 = arith.truncf %48 : vector<16x32xf32> to vector<16x32xbf16>
      %c48 = arith.constant 48 : index
      %c0_36 = arith.constant 0 : index
      %50 = vector.load %arg14[%c48, %c0_36] : memref<64x32xbf16, #tpu.memory_space<vmem>>, vector<16x32xbf16>
      tpu.vector_store %arg14[%c48, %c0_36], %49 {strides = array<i32>} : memref<64x32xbf16, #tpu.memory_space<vmem>>, vector<16x32xbf16>,
    } else {
    }
    %c1_i32_3 = arith.constant 1 : i32
    %8 = arith.cmpi eq, %arg1, %c1_i32_3 : i32
    %9 = arith.extui %8 : i1 to i32
    %c0_i32_4 = arith.constant 0 : i32
    %10 = arith.cmpi ne, %9, %c0_i32_4 : i32
    scf.if %10 {
      %c0 = arith.constant 0 : index
      %c0_5 = arith.constant 0 : index
      %c0_6 = arith.constant 0 : index
      %11 = vector.load %arg3[%c0, %c0_5, %c0_6] : memref<1x8x32xbf16, #tpu.memory_space<vmem>>, vector<1x8x32xbf16>
      %12 = vector.shape_cast %11 : vector<1x8x32xbf16> to vector<8x32xbf16>
      %c0_7 = arith.constant 0 : index
      %c0_8 = arith.constant 0 : index
      %13 = vector.load %arg5[%c0_7, %c0_8] : memref<32x64xbf16, #tpu.memory_space<vmem>>, vector<32x64xbf16>
      %cst = arith.constant dense<0.000000e+00> : vector<8x64xf32>
      %14 = tpu.matmul %12, %13, %cst {dimension_numbers = #tpu.dot_dimension_numbers<[1], [0], [0], [1], [0, 0, 1, 1], [], []>} : vector<8x32xbf16>, vector<32x64xbf16>, vector<8x64xf32> -> vector<8x64xf32>
      %15 = arith.truncf %14 : vector<8x64xf32> to vector<8x64xbf16>
      %c0_9 = arith.constant 0 : index
      %c0_10 = arith.constant 0 : index
      %16 = vector.load %arg14[%c0_9, %c0_10] : memref<64x32xbf16, #tpu.memory_space<vmem>>, vector<64x32xbf16>
      %cst_11 = arith.constant dense<0.000000e+00> : vector<8x32xf32>
      %17 = tpu.matmul %15, %16, %cst_11 {dimension_numbers = #tpu.dot_dimension_numbers<[1], [0], [0], [1], [0, 0, 1, 1], [], []>} : vector<8x64xbf16>, vector<64x32xbf16>, vector<8x32xf32> -> vector<8x32xf32>
      %c0_12 = arith.constant 0 : index
      %c0_13 = arith.constant 0 : index
      %18 = vector.load %arg11[%c0_12, %c0_13] : memref<1x32xf32, #tpu.memory_space<vmem>>, vector<1x32xf32>
      %19 = vector.broadcast %18 : vector<1x32xf32> to vector<8x32xf32>
      %20 = arith.addf %17, %19 : vector<8x32xf32>
      %c0_14 = arith.constant 0 : index
      %c0_15 = arith.constant 0 : index
      %c0_16 = arith.constant 0 : index
      %21 = vector.load %arg12[%c0_14, %c0_15, %c0_16] : memref<1x8x32xf32, #tpu.memory_space<vmem>>, vector<1x8x32xf32>
      %22 = vector.shape_cast %21 : vector<1x8x32xf32> to vector<8x32xf32>
      %23 = vector.shape_cast %20 : vector<8x32xf32> to vector<1x8x32xf32>
      tpu.vector_store %arg12[%c0_14, %c0_15, %c0_16], %23 {strides = array<i32>} : memref<1x8x32xf32, #tpu.memory_space<vmem>>, vector<1x8x32xf32>,
    } else {
    }
    return
  }
  func.func @transform_0(%arg0: i32, %arg1: i32, %arg2: i32) -> (i32, i32, i32) {
    %c0_i32 = arith.constant 0 : i32
    %c0_i32_0 = arith.constant 0 : i32
    return %arg0, %arg2, %c0_i32 : i32, i32, i32
  }
  func.func @transform_1(%arg0: i32, %arg1: i32, %arg2: i32) -> (i32, i32) {
    %c0_i32 = arith.constant 0 : i32
    %c0_i32_0 = arith.constant 0 : i32
    %c0_i32_1 = arith.constant 0 : i32
    return %c0_i32, %c0_i32_0 : i32, i32
  }
  func.func @transform_2(%arg0: i32, %arg1: i32, %arg2: i32) -> (i32, i32) {
    %c0_i32 = arith.constant 0 : i32
    %c0_i32_0 = arith.constant 0 : i32
    %c0_i32_1 = arith.constant 0 : i32
    return %c0_i32, %c0_i32_0 : i32, i32
  }
  func.func @transform_3(%arg0: i32, %arg1: i32, %arg2: i32) -> (i32, i32, i32) {
    %c0_i32 = arith.constant 0 : i32
    %c0_i32_0 = arith.constant 0 : i32
    %c0_i32_1 = arith.constant 0 : i32
    %c0_i32_2 = arith.constant 0 : i32
    return %c0_i32, %c0_i32_0, %c0_i32_1 : i32, i32, i32
  }
  func.func @transform_4(%arg0: i32, %arg1: i32, %arg2: i32) -> (i32, i32, i32) {
    %c0_i32 = arith.constant 0 : i32
    %c0_i32_0 = arith.constant 0 : i32
    %c0_i32_1 = arith.constant 0 : i32
    %c0_i32_2 = arith.constant 0 : i32
    return %c0_i32, %c0_i32_0, %c0_i32_1 : i32, i32, i32
  }
  func.func @transform_5(%arg0: i32, %arg1: i32, %arg2: i32) -> (i32, i32, i32) {
    %c0_i32 = arith.constant 0 : i32
    %c0_i32_0 = arith.constant 0 : i32
    %c0_i32_1 = arith.constant 0 : i32
    %c0_i32_2 = arith.constant 0 : i32
    return %c0_i32, %c0_i32_0, %c0_i32_1 : i32, i32, i32
  }
  func.func @transform_6(%arg0: i32, %arg1: i32, %arg2: i32) -> (i32, i32, i32) {
    %c0_i32 = arith.constant 0 : i32
    %c0_i32_0 = arith.constant 0 : i32
    %c0_i32_1 = arith.constant 0 : i32
    %c0_i32_2 = arith.constant 0 : i32
    return %c0_i32, %c0_i32_0, %c0_i32_1 : i32, i32, i32
  }
  func.func @transform_7(%arg0: i32, %arg1: i32, %arg2: i32) -> (i32, i32, i32) {
    %c0_i32 = arith.constant 0 : i32
    %c0_i32_0 = arith.constant 0 : i32
    %c0_i32_1 = arith.constant 0 : i32
    %c0_i32_2 = arith.constant 0 : i32
    return %c0_i32, %c0_i32_0, %c0_i32_1 : i32, i32, i32
  }
  func.func @transform_8(%arg0: i32, %arg1: i32, %arg2: i32) -> (i32, i32) {
    %c0_i32 = arith.constant 0 : i32
    %c0_i32_0 = arith.constant 0 : i32
    %c0_i32_1 = arith.constant 0 : i32
    return %c0_i32, %c0_i32_0 : i32, i32
  }
  func.func @transform_9(%arg0: i32, %arg1: i32, %arg2: i32) -> (i32, i32, i32) {
    %0 = arith.muli %arg1, %arg2 : i32
    %c0_i32 = arith.constant 0 : i32
    %c0_i32_0 = arith.constant 0 : i32
    return %arg0, %0, %c0_i32 : i32, i32, i32
  }
}

</mosaic_0001>

<bundles_post_ra>
// kernel: tpu_custom_call.1
= control target key start
LH: loop header
LB: loop body
LE: loop exit
PB: predicated region body
PF: predicated region fallthrough
CT: control target
= control target key end

     0   :  { %s2750_s0 = inlined_call_operand.hbm [shape: bf16[2,16,32], index: 0, kind: input, shape index: {}]   ;;  %s2751_s1 = inlined_call_operand.hbm [shape: bf16[32,128], index: 1, kind: input, shape index: {}]   ;;  %s2752_s2 = inlined_call_operand.hbm [shape: bf16[32,64], index: 2, kind: input, shape index: {}]   ;;  %s2753_s3 = inlined_call_operand.hbm [shape: f32[4,1,16], index: 3, kind: input, shape index: {}]   ;;  %s2754_s4 = inlined_call_operand.hbm [shape: f32[4,1,16], index: 4, kind: input, shape index: {}]   ;;  %s2755_s5 = inlined_call_operand.vmem [shape: f32[4,1,16], index: 5, kind: input, shape index: {}]   ;;  %s2756_s6 = inlined_call_operand.hbm [shape: f32[4,1,16], index: 6, kind: input, shape index: {}]   ;;  %s2757_s7 = inlined_call_operand.hbm [shape: bf16[4,16,32], index: 7, kind: input, shape index: {}]   ;;  %s2758_s8 = inlined_call_operand.vmem [shape: f32[1,32], index: 8, kind: input, shape index: {}]   ;;  %s2759_s9 = inlined_call_operand.hbm [shape: f32[2,16,32], index: 9, kind: output, shape index: {}]  }
   0x1   :  { %2768 = sst [smem:[#allocation30_spill]] %s2750_s0 }
   0x2   :  { %2769 = sst [smem:[#allocation31_spill]] %s2751_s1 }
   0x3   :  { %2770 = sst [smem:[#allocation32_spill]] %s2752_s2 }
   0x4   :  { %2771 = sst [smem:[#allocation33_spill]] %s2753_s3 }
   0x5   :  { %2772 = sst [smem:[#allocation34_spill]] %s2754_s4 }
   0x6   :  { %2773 = sst [smem:[#allocation35_spill]] %s2755_s5 }
   0x7   :  { %2774 = sst [smem:[#allocation36_spill]] %s2756_s6 }
   0x8   :  { %2775 = sst [smem:[#allocation37_spill]] %s2757_s7 }
   0x9   :  { %2776 = sst [smem:[#allocation38_spill]] %s2758_s8 }
   0xa   :  { %2777 = sst [smem:[#allocation39_spill]] %s2759_s9 }
   0xb   :  { %14 = vsyncpa [#allocation5], 0 }
   0xc   :  { %16 = vsyncpa [#allocation5 + $0x1], 0 }
   0xd   :  { %17 = vsyncpa [#allocation8], 0 }
   0xe   :  { %18 = vsyncpa [#allocation11], 0 }
   0xf   :  { %19 = vsyncpa [#allocation14], 0 }
  0x10   :  { %20 = vsyncpa [#allocation6], 0 }
  0x11   :  { %22 = vsyncpa [#allocation6 + $0x1], 0  ;;  %s2263_s30 = smov 0   ;;  %s2265_s10 = smov 0  }
  0x12   :  { %s2267_s11 = smov 0   ;;  %s2269_s12 = smov 0  }
  0x13   :  { %s2271_s13 = smov 0   ;;  %s2273_s14 = smov 0  }
  0x14   :  { %s2275_s15 = smov 0   ;;  %s2277_s16 = smov 0  }
  0x15   :  { %s2279_s17 = smov 0   ;;  %s2281_s18 = smov 0  }
  0x16   :  { %s2283_s19 = smov 0   ;;  %s2285_s20 = smov 0  }
  0x17   :  { %s2287_s21 = smov 0  }
  0x18 LB: > { %2778 = sst [smem:[#allocation22_spill]] %s2144_s30  ;;  %s2760_s22 = sadd.s32 4294967295, %s2192_s21   ;;  %s2192_s21 = sphi %s2287_s21, %s28_s21   ;;  %s2188_s20 = sphi %s2285_s20, %s2831_s20   ;;  %s2184_s19 = sphi %s2283_s19, %s2830_s19   ;;  %s2180_s18 = sphi %s2281_s18, %s2829_s18   ;;  %s2176_s17 = sphi %s2279_s17, %s2828_s17   ;;  %s2172_s16 = sphi %s2277_s16, %s2827_s16   ;;  %s2168_s15 = sphi %s2275_s15, %s2826_s15   ;;  %s2164_s14 = sphi %s2273_s14, %s2825_s14   ;;  %s2160_s13 = sphi %s2271_s13, %s2824_s13   ;;  %s2156_s12 = sphi %s2269_s12, %s2823_s12   ;;  %s2152_s11 = sphi %s2267_s11, %s2822_s11   ;;  %s2148_s10 = sphi %s2265_s10, %s2821_s10   ;;  %s2144_s30 = sphi %s2263_s30, %s2820_s30  }
  0x19   : > { %2779 = sst [smem:[#allocation23_spill]] %s2168_s15  ;;  %p1499_p0 = scmp.ge.s32.totalorder %s2192_s21, 1 }
  0x1a   : > { %2780 = sst [smem:[#allocation24_spill]] %s2172_s16  ;;  %p2332_p1 = scmp.eq.s32.totalorder %s2760_s22, 0 }
  0x1b   : > { %2781 = sst [smem:[#allocation25_spill]] %s2176_s17  ;;  %p278_p2 = scmp.lt.s32.totalorder %s2192_s21, 9 }
  0x1c   : > { %s2783_s1 = sld [smem:[#allocation31_spill]]  ;;  %s2194_s28 = smov [#allocation7]  }
  0x1d   : > { %p2340_p3 = pnand %p1499_p0, %p278_p2  ;;  %s291_s29 = sshll.u32 %s2194_s28, 4  ;;  %s292_s29 = int_to_ptr.vmem [resolvable:$true] %s291_s29 }
  0x1e   : > { %s2787_s3 = sld [smem:[#allocation33_spill]]  ;;  %s2195_s25 = smov 64  }
  0x1f   : > { %s2784_s27 = scalar_select %p2340_p3, 1, 0 }
  0x20   : > { %p1629_p4 = pneg %p2340_p3  ;;  %s2197_s28 = smov [#allocation10]  }
  0x21   : > { %2785 = sst [smem:[#allocation26_spill]] %s2784_s27  ;;  %s319_s8 = sshll.u32 %s2197_s28, 4  ;;  %s320_s8 = int_to_ptr.vmem [resolvable:$true] %s319_s8 }
  0x22   : > { %s289_s26 = sshll.u32 %s2783_s1, 4  ;;  %p2348_p5 = pnand %p1629_p4, %p2332_p1  ;;  %s290_s26 = int_to_ptr.hbm [resolvable:$true] %s289_s26 }
  0x23   : > { %s2196_s1 = smov 4   ;;  %s2198_s5 = smov 16  }
  0x24   : > { %s317_s24 = sshll.u32 %s2787_s3, 4  ;;  %s2199_s15 = smov 1   ;;  %s318_s24 = int_to_ptr.hbm [resolvable:$true] %s317_s24 }
  0x25   : > { %1632 = dma.hbm_to_vmem [thread:$0]  (!%p2348_p5), %s290_s26, 256, %s292_s29, [#allocation8], %s2195_s25, %s2195_s25, %s2196_s1  }
  0x26   : > { %1638 = dma.hbm_to_vmem [thread:$0]  (!%p2348_p5), %s318_s24, 64, %s320_s8, [#allocation11], %s2198_s5, %s2198_s5, %s2199_s15  }
  0x27   : > { %s2788_s6 = sld [smem:[#allocation36_spill]]  ;;  %s2200_s16 = smov [#allocation13]  }
  0x28   : > { %s350_s27 = sshll.u32 %s2200_s16, 4  ;;  %s2789_s2 = sld [smem:[#allocation32_spill]]  ;;  %s351_s27 = int_to_ptr.vmem [resolvable:$true] %s350_s27 }
  0x29   : > { %s2201_s29 = smov [#allocation9]   ;;  %s2790_s4 = sld [smem:[#allocation34_spill]] }
  0x2a   : > { %s305_s8 = sshll.u32 %s2201_s29, 4  ;;  %s2791_s7 = sld [smem:[#allocation37_spill]]  ;;  %s306_s8 = int_to_ptr.vmem [resolvable:$true] %s305_s8 }
  0x2b   : > { %s2202_s16 = smov [#allocation12]   ;;  %s2203_s17 = smov [#allocation15]  }
  0x2c   : > { %s1498_s29 = sadd.s32 4294967294, %s2192_s21   ;;  %s43_s24 = sadd.s32 1, %s2184_s19 }
  0x2d   : > { %s348_s3 = sshll.u32 %s2788_s6, 4  ;;  %p63_p7 = scmp.ne.s32.totalorder %s2164_s14, %s2160_s13  ;;  %s349_s3 = int_to_ptr.hbm [resolvable:$true] %s348_s3 }
  0x2e   : > { %s303_s26 = sshll.u32 %s2789_s2, 4  ;;  %p64_p9 = scmp.eq.s32.totalorder %s2192_s21, 0  ;;  %s304_s26 = int_to_ptr.hbm [resolvable:$true] %s303_s26 }
  0x2f   : > { %1644 = dma.hbm_to_vmem [thread:$0]  (!%p2348_p5), %s349_s3, 64, %s351_s27, [#allocation14], %s2198_s5, %s2198_s5, %s2199_s15  }
  0x30   : > { %s331_s9 = sshll.u32 %s2790_s4, 4  ;;  %s362_s30 = sshll.u32 %s2791_s7, 4  ;;  %s332_s9 = int_to_ptr.hbm [resolvable:$true] %s331_s9  ;;  %s363_s30 = int_to_ptr.hbm [resolvable:$true] %s362_s30 }
  0x31   : > { %1635 = dma.hbm_to_vmem [thread:$0]  (!%p2348_p5), %s304_s26, 256, %s306_s8, [#allocation8], %s2195_s25, %s2195_s25, %s2196_s1  }
  0x32   : > { %s333_s27 = sshll.u32 %s2202_s16, 4  ;;  %s364_s26 = sshll.u32 %s2203_s17, 4  ;;  %s334_s27 = int_to_ptr.vmem [resolvable:$true] %s333_s27  ;;  %s365_s26 = int_to_ptr.vmem [resolvable:$true] %s364_s26 }
  0x33   : > { %1641 = dma.hbm_to_vmem [thread:$0]  (!%p2348_p5), %s332_s9, 64, %s334_s27, [#allocation11], %s2198_s5, %s2198_s5, %s2199_s15  }
  0x34   : > { %1647 = dma.hbm_to_vmem [thread:$0]  (!%p2348_p5), %s363_s30, 512, %s365_s26, [#allocation14], %s2195_s25, %s2195_s25, %s2196_s1  }
  0x35   : > { %s40_s8 = sadd.s32 1, %s2180_s18  ;;  %s47_s5 = sadd.s32 1, %s2188_s20 }
  0x36   : > { %p41_p6 = scmp.ge.s32.totalorder %s40_s8, 2  ;;  %s56_s15 = sadd.s32 1, %s2164_s14 }
  0x37   : > { %s2793_s1 = sld [smem:[#allocation22_spill]]  ;;  %p69_p10 = scmp.ne.s32.totalorder %s2160_s13, %s2156_s12 }
  0x38   : > { %s2833_s8 = smov (%p41_p6, %s40_s8), 0  ;;  %s2835_s24 = smov (!%p41_p6, %s43_s24), %s2184_s19 }
  0x39   : > { %2792 = sst [smem:[#allocation27_spill]] %s2833_s8  ;;  %s52_s22 = ssub.s32 %s2180_s18, %s2833_s8 }
  0x3a   : > { %p45_p8 = scmp.ge.s32.totalorder %s2835_s24, 2  ;;  %s247_s25 = smul.u32 %s2180_s18, %s2184_s19 }
  0x3b   : > { %p2408_p11 = por %p64_p9, %p63_p7  ;;  %p2414_p12 = por %p2332_p1, %p69_p10 }
  0x3c   : > { %s2837_s24 = smov (%p45_p8, %s2835_s24), 0  ;;  %s2839_s5 = smov (!%p45_p8, %s47_s5), %s2188_s20 }
  0x3d   : > { %2794 = sst [smem:[#allocation28_spill]] %s2837_s24  ;;  %p49_p13 = scmp.ge.s32.totalorder %s2839_s5, 2 }
  0x3e   : > { %s248_s0 = smul.u32 %s2837_s24, %s2833_s8  ;;  %s254_s12 = sadd.s32 1, %s2152_s11 }
  0x3f   : > { %p264_p0 = scmp.ne.s32.totalorder %s2152_s11, %s2148_s10  ;;  %s2841_s5 = smov (%p49_p13, %s2839_s5), 0 }
  0x40   : > { %2797 = sst [smem:[#allocation29_spill]] %s2841_s5  ;;  %s250_s3 = ssub.s32 %s247_s25, %s248_s0 }
  0x41   : > { %s2798_s30 = sadd.s32 4294967295, %s2192_s21   ;;  %s51_s16 = ssub.s32 %s2188_s20, %s2841_s5 }
  0x42   : > { %p265_p2 = scmp.eq.s32.totalorder %s2798_s30, 7  ;;  %p270_p4 = scmp.ne.s32.totalorder %s2148_s10, %s2793_s1 }
  0x43   : > { %s53_s27 = sor.u32 %s52_s22, %s51_s16  ;;  %s251_s17 = sor.u32 %s250_s3, %s51_s16 }
  0x44   : > { %p54_p5 = scmp.eq.s32.totalorder %s53_s27, 0  ;;  %p252_p6 = scmp.eq.s32.totalorder %s251_s17, 0 }
  0x45   : > { %p2431_p7 = por %p265_p2, %p264_p0  ;;  %p271_p8 = scmp.eq.s32.totalorder %s1498_s29, 7 }
  0x46   : > { %s2438_s2 = scalar_select %p54_p5, %s2164_s14, %s56_s15  }
  0x47   : > { %s2441_s4 = scalar_select %p252_p6, %s2152_s11, %s254_s12  }
  0x48   : > { %p2443_p9 = por %p271_p8, %p270_p4  ;;  %p1662_p10 = scmp.lt.s32.totalorder %s2192_s21, 8 }
  0x49   : > { %s381_s22 = sand.u32 1, %s2164_s14   ;;  %s1508_s1 = sshll.u32 %s2188_s20, 1 }
  0x4a   : > { %s1507_s0 = sshll.u32 %s381_s22, 2  ;;  %s389_s3 = sadd.s32 %s2180_s18, %s1508_s1 }
  0x4b   : > { %s1509_s30 = sshll.u32 %s389_s3, 2  ;;  %s385_s16 = scalar_lea.vmem [#allocation4], %s1507_s0 }
  0x4c   : > { %s395_s27 = sshll.u32 %s385_s16, 4  ;;  %s2801_s7 = sld [smem:[#allocation30_spill]]  ;;  %s396_s27 = int_to_ptr.vmem [resolvable:$true] %s395_s27 }
  0x4d   : > { %p1649_p13 = pnand %p1662_p10, %p2408_p11  ;;  %s382_s12 = scalar_lea.sflag [#allocation5], %s381_s22 }
  0x4e   : > { %s406_s1 = sand.u32 (!%p2340_p3), 1, %s2160_s13  }
  0x4f   : > { %s2459_s3 = sshll.u32 (!%p2340_p3), %s406_s1, 2  ;;  %s407_s0 = scalar_lea.sflag (!%p2340_p3), [#allocation5], %s406_s1 }
  0x50   : > { %404 = sbr.rel (%p2340_p3) target bundleno = 1888 (0x760), region = 56  ;;  %s410_s16 = scalar_lea.vmem (!%p2340_p3), [#allocation4], %s2459_s3 }
  0x52   : > { %s391_s29 = scalar_lea.hbm %s2801_s7, %s1509_s30 }
  0x53   : > { %s393_s15 = sshll.u32 %s391_s29, 4  ;;  %s394_s15 = int_to_ptr.hbm [resolvable:$true] %s393_s15 }
  0x54   : > { %1651 = dma.hbm_to_vmem [thread:$0]  (!%p1649_p13), %s394_s15, 64, %s396_s27, %s382_s12  }
  0x55   : > { %2123 = dma.done.wait (%p2414_p12), %s407_s0, 64  }
  0x56   : > { %2125 = vsyncadd (%p2414_p12), %s407_s0, 4294967232 }
  0x57   : > { %2127 = dma.done.wait (%p2332_p1), [#allocation8], 512  }
  0x58   : > { %2129 = vsyncadd (%p2332_p1), [#allocation8], 4294966784 }
  0x59   : > { %2131 = dma.done.wait (%p2332_p1), [#allocation11], 128  }
  0x5a   : > { %2133 = vsyncadd (%p2332_p1), [#allocation11], 4294967168 }
  0x5b   : > { %2135 = dma.done.wait (%p2332_p1), [#allocation14], 576  }
  0x5c   : > { %2137 = vsyncadd (%p2332_p1), [#allocation14], 4294966720  ;;  %s473_s6 = sand.u32 1, %s2148_s10   ;;  %s2803_s28 = sld [smem:[#allocation24_spill]] }
  0x5d   : > { %s2481_s7 = sshll.u32 %s473_s6, 3 }
  0x5e   : > { %s475_s5 = scalar_lea.vmem [#allocation16], %s2481_s7 }
  0x62   : > { %p1519_p3 = scmp.ne.s32.totalorder %s2803_s28, 0 }
  0x63   : > { %s2804_s9 = sld [smem:[#allocation23_spill]] (!%p1519_p3) }
  0x64   : > { %481 = sbr.rel (%p1519_p3) target bundleno = 1412 (0x584), region = 88 }
  0x69   : > { %p1520_p11 = scmp.ne.s32.totalorder %s2804_s9, 0 }
  0x6b   : > { %485 = sbr.rel (%p1520_p11) target bundleno = 121 (0x79), region = 92 }
  0x70   : > { %vm486_vm0 = vcmask 130048   ;;  %v2204_v0 = vmov 0.0  }
  0x71   : > { %487 = vst.msk [vmem:[#allocation2] sm:$0xff] %vm486_vm0, %v2204_v0 }
  0x72   : > { %488 = vst.msk [vmem:[#allocation2 + $0x8] sm:$0xff] %vm486_vm0, %v2204_v0 }
  0x73   : > { %489 = vst.msk [vmem:[#allocation2 + $0x10] sm:$0xff] %vm486_vm0, %v2204_v0 }
  0x74   : > { %490 = vst.msk [vmem:[#allocation2 + $0x18] sm:$0xff] %vm486_vm0, %v2204_v0 }
  0x75   : > { %491 = vst.msk [vmem:[#allocation2 + $0x20] sm:$0xff] %vm486_vm0, %v2204_v0 }
  0x76   : > { %492 = vst.msk [vmem:[#allocation2 + $0x28] sm:$0xff] %vm486_vm0, %v2204_v0 }
  0x77   : > { %493 = vst.msk [vmem:[#allocation2 + $0x30] sm:$0xff] %vm486_vm0, %v2204_v0 }
  0x78   : > { %494 = vst.msk [vmem:[#allocation2 + $0x38] sm:$0xff] %vm486_vm0, %v2204_v0 }
  0x79 PF: > { %v1590_v1 = vld [vmem:[#allocation7 + $0x8] sm:$0xff]  ;;  %s2805_s30 = sld [smem:[#allocation35_spill]]  ;;  %v1589_v3 = vld [vmem:[#allocation7] sm:$0xff]  ;;  %s2205_s17 = smov 64   ;;  %v495_v5 = vld [vmem:[%s410_s16] sm:$0xf] }
  0x7a   : > { %522 = vmatpush.bf16.msra.mxu0 %v1590_v1  ;;  %v1800_v4 = vld [vmem:[#allocation10 + $0x1] ss:$0 sm:$0xff]  ;;  %v1798_v6 = vld [vmem:[#allocation13] ss:$0 sm:$0xff]  ;;  %s2206_s29 = smov 16   ;;  %vm512_vm1 = vcmask 261120  }
  0x7b   : > { %697 = vrot.lane.b32.xlu1 %v1800_v4, %s2206_s29  ;;  %v1801_v7 = vld [vmem:[#allocation12 + $0x1] ss:$0 sm:$0xff]  ;;  %v1799_v8 = vld [vmem:[#allocation13 + $0x1] ss:$0 sm:$0xff]  ;;  %s2207_s1 = smov 80   ;;  %vm531_vm2 = vcmask 130048  }
  0x7c   : > { %s2208_s0 = smov 32   ;;  %s2209_s28 = smov 112   ;;  %v2212_v15 = vmov 16.0   ;;  %vm640_vm13 = vcmask 1043456   ;;  %vm636_vm14 = vcmask 64512  }
  0x7d   : > { %s2210_s9 = smov 96   ;;  %s2211_s23 = smov 48   ;;  %1813 = vrcp.f32 %v2212_v15 }
  0x7e   : > { %523 = vmatpush.bf16.msra.mxu0 %v1589_v3 }
  0x7f   : > { %s2806_s27 = smov %s2805_s30  ;;  %v1797_v2 = vld [vmem:[%s2805_s30] ss:$0 sm:$0xff] }
  0x80   : > { %603 = vrot.lane.b32.xlu0 %v1797_v2, %s2205_s17  ;;  %v1802_v9 = vld [vmem:[%s2806_s27 + $0x1] ss:$0 sm:$0xff] }
  0x81   : > { %1529 = vmatmul.msk.bf16.vlgmr.msra.gmra.mxu0 %vm512_vm1, %v495_v5  ;;  %v1803_v5 = vld [vmem:[#allocation10] ss:$0 sm:$0xff] }
  0x83   : > { %703 = vrot.lane.b32.xlu1 %v1801_v7, %s2206_s29  ;;  %v1814_v18 = vpop.eup %1813 }
  0x84   : > { %v536_v21 = vmul.f32 16.0, %v1814_v18  ;;  %vm540_vm3 = vweird.f32 %v1814_v18 }
  0x86   : > { %v537_v22 = vsub.f32 1.0, %v536_v21 }
  0x88   : > { %609 = vrot.lane.b32.xlu0 %v1798_v6, %s2205_s17  ;;  %v538_v25 = vmul.f32 %v1814_v18, %v537_v22 }
  0x8a   : > { %v539_v28 = vadd.f32 %v1814_v18, %v538_v25 }
  0x8b   : > { %742 = vrot.lane.b32.xlu1 %v1802_v9, %s2207_s1 }
  0x8c   : > { %v2531_v30 = vsel %vm540_vm3, %v1814_v18, %v539_v28 }
  0x90   : > { %748 = vrot.lane.b32.xlu0 %v1799_v8, %s2207_s1  ;;  %v1804_v8 = vld [vmem:[#allocation12] ss:$0 sm:$0xff] }
  0xed   : > { %v2518_v13 = vpop.permute.xlu1 %697 }
  0xf2   : > { %v2520_v14 = vpop.permute.xlu0 %603 }
  0xf5   : > { %v2522_v17 = vpop.permute.xlu1 %703 }
  0xfa   : > { %v2524_v19 = vpop.permute.xlu0 %609 }
  0xfd   : > { %v2526_v23 = vpop.permute.xlu1 %742 }
  0xfe   : > { %v2500_v10 = vpop.f32.mrf.mxu0 }
  0xff   : > { %950 = vrot.lane.b32.xlu2 %v2500_v10, %s2207_s1  ;;  %572 = vrot.lane.b32.xlu1 %v2500_v10, %s2205_s17  ;;  %v532_v11 = vsel %vm531_vm2, %v2500_v10, 0.0 }
 0x100   : > { %533 = vadd.xlane.f32.xlu0 %v532_v11 }
 0x102   : > { %v2529_v27 = vpop.permute.xlu0 %748 }
 0x106   : > { %v527_v12 = vpop.f32.mrf.mxu0 }
 0x107   : > { %853 = vrot.lane.b32.xlu2 %v2500_v10, %s2208_s0  ;;  %666 = vrot.lane.b32.xlu1 %v2500_v10, %s2209_s28 }
 0x10f   : > { %995 = vrot.lane.b32.xlu2 %v2500_v10, %s2206_s29  ;;  %808 = vrot.lane.b32.xlu1 %v2500_v10, %s2210_s9 }
 0x117   : > { %711 = vrot.lane.b32.xlu1 %v2500_v10, %s2211_s23 }
 0x159   : > { %v951_v16 = vpop.permute.xlu2 %950 }
 0x15a   : > { %v953_v43 = vsel %vm531_vm2, %v951_v16, 0.0 }
 0x161   : > { %v854_v20 = vpop.permute.xlu2 %853 }
 0x162   : > { %v856_v44 = vsel %vm531_vm2, %v854_v20, 0.0 }
 0x169   : > { %v996_v24 = vpop.permute.xlu2 %995 }
 0x16a   : > { %v998_v26 = vsel %vm531_vm2, %v996_v24, 0.0 }
 0x16b   : > { %999 = vadd.xlane.f32.xlu0 %v998_v26 }
 0x171   : > { %v573_v29 = vpop.permute.xlu1 %572 }
 0x172   : > { %v575_v31 = vsel %vm531_vm2, %v573_v29, 0.0 }
 0x173   : > { %576 = vadd.xlane.f32.xlu1 %v575_v31  ;;  %v534_v32 = vpop.xlane.xlu0 %533 }
 0x174   : > { %v542_v33 = vmul.f32 %v2531_v30, %v534_v32 }
 0x176   : > { %v543_v34 = vsub.f32 %v2500_v10, %v542_v33 }
 0x178   : > { %v544_v35 = vmul.f32 %v543_v34, %v543_v34 }
 0x179   : > { %v667_v36 = vpop.permute.xlu1 %666 }
 0x17a   : > { %v669_v37 = vsel %vm531_vm2, %v667_v36, 0.0  ;;  %v545_v38 = vsel %vm531_vm2, %v544_v35, 0.0 }
 0x17b   : > { %670 = vadd.xlane.f32.xlu2 %v669_v37  ;;  %546 = vadd.xlane.f32.xlu0 %v545_v38 }
 0x181   : > { %v809_v39 = vpop.permute.xlu1 %808 }
 0x182   : > { %v811_v40 = vsel %vm531_vm2, %v809_v39, 0.0 }
 0x183   : > { %812 = vadd.xlane.f32.xlu2 %v811_v40 }
 0x189   : > { %v712_v41 = vpop.permute.xlu1 %711 }
 0x18a   : > { %v714_v42 = vsel %vm531_vm2, %v712_v41, 0.0 }
 0x18b   : > { %715 = vadd.xlane.f32.xlu1 %v714_v42 }
 0x193   : > { %954 = vadd.xlane.f32.xlu1 %v953_v43 }
 0x19b   : > { %857 = vadd.xlane.f32.xlu1 %v856_v44 }
 0x1de   : > { %v1000_v45 = vpop.xlane.xlu0 %999 }
 0x1df   : > { %v1001_v20 = vmul.f32 %v1000_v45, %v2531_v30 }
 0x1e1   : > { %v2580_v26 = vsub.f32 %v2500_v10, %v1001_v20 }
 0x1e3   : > { %v1003_v32 = vmul.f32 %v2580_v26, %v2580_v26 }
 0x1e6   : > { %v577_v46 = vpop.xlane.xlu1 %576 }
 0x1e7   : > { %v578_v47 = vmul.f32 %v577_v46, %v2531_v30 }
 0x1e9   : > { %v2544_v48 = vsub.f32 %v2500_v10, %v578_v47 }
 0x1eb   : > { %v580_v49 = vmul.f32 %v2544_v48, %v2544_v48 }
 0x1ed   : > { %582 = vrot.lane.b32.xlu2 %v580_v49, %s2205_s17 }
 0x1ee   : > { %v671_v50 = vpop.xlane.xlu2 %670  ;;  %v547_v51 = vpop.xlane.xlu0 %546 }
 0x1ef   : > { %v672_v52 = vmul.f32 %v671_v50, %v2531_v30  ;;  %v548_v53 = vmul.f32 %v547_v51, %v2531_v30 }
 0x1f1   : > { %v2552_v54 = vsub.f32 %v2500_v10, %v672_v52  ;;  %v549_v55 = vadd.f32 1e-05, %v548_v53 }
 0x1f3   : > { %1815 = vrsqrt.f32 %v549_v55  ;;  %v674_v56 = vmul.f32 %v2552_v54, %v2552_v54  ;;  %vm556_vm5 = vweird.f32 %v549_v55 }
 0x1f5   : > { %676 = vrot.lane.b32.xlu1 %v674_v56, %s2209_s28 }
 0x1f6   : > { %v813_v0 = vpop.xlane.xlu2 %812 }
 0x1f7   : > { %v814_v3 = vmul.f32 %v813_v0, %v2531_v30 }
 0x1f9   : > { %v1816_v57 = vpop.eup %1815  ;;  %v2566_v11 = vsub.f32 %v2500_v10, %v814_v3 }
 0x1fa   : > { %v551_v58 = vmul.f32 %v1816_v57, %v549_v55  ;;  %vm557_vm4 = vweird.f32 %v1816_v57 }
 0x1fb   : > { %vm558_vm6 = vmor %vm556_vm5, %vm557_vm4  ;;  %v816_v21 = vmul.f32 %v2566_v11, %v2566_v11 }
 0x1fc   : > { %v552_v59 = vmul.f32 %v1816_v57, %v551_v58 }
 0x1fe   : > { %v553_v60 = vmul.f32 0.5, %v552_v59  ;;  %v716_v61 = vpop.xlane.xlu1 %715  ;;  %v1805_v59 = vld [vmem:[#allocation10 + $0x2] ss:$0 sm:$0xff] }
 0x1ff   : > { %v717_v62 = vmul.f32 %v716_v61, %v2531_v30 }
 0x200   : > { %v554_v63 = vsub.f32 1.5, %v553_v60  ;;  %v1806_v60 = vld [vmem:[#allocation10 + $0x3] ss:$0 sm:$0xff] }
 0x201   : > { %v2559_v1 = vsub.f32 %v2500_v10, %v717_v62 }
 0x202   : > { %v555_v2 = vmul.f32 %v1816_v57, %v554_v63 }
 0x203   : > { %v719_v4 = vmul.f32 %v2559_v1, %v2559_v1 }
 0x204   : > { %v559_v6 = vsel %vm558_vm6, %v1816_v57, %v555_v2 }
 0x205   : > { %721 = vrot.lane.b32.xlu2 %v719_v4, %s2211_s23  ;;  %v560_v7 = vmul.f32 %v559_v6, %v543_v34 }
 0x206   : > { %v955_v9 = vpop.xlane.xlu1 %954 }
 0x207   : > { %v956_v12 = vmul.f32 %v955_v9, %v2531_v30  ;;  %v564_v15 = vmul.f32 %v1803_v5, %v560_v7 }
 0x209   : > { %v2570_v16 = vsub.f32 %v2500_v10, %v956_v12  ;;  %v568_v18 = vadd.f32 %v1804_v8, %v564_v15 }
 0x20b   : > { %v958_v22 = vmul.f32 %v2570_v16, %v2570_v16  ;;  %v615_v24 = vpack.c.bf16 %v568_v18, %v568_v18 }
 0x20d   : > { %818 = vrot.lane.b32.xlu2 %v816_v21, %s2210_s9  ;;  %960 = vrot.lane.b32.xlu1 %v958_v22, %s2207_s1  ;;  %v1808_v21 = vld [vmem:[#allocation12 + $0x3] ss:$0 sm:$0xff]  ;;  %v1810_v22 = vld [vmem:[#allocation13 + $0x2] ss:$0 sm:$0xff] }
 0x20e   : > { %617 = vxpose.xlu0.c.b16.start.end [1/1] (short) (narrow) %v615_v24, 16  ;;  %v858_v25 = vpop.xlane.xlu1 %857  ;;  %v1812_v24 = vld [vmem:[#allocation13 + $0x3] ss:$0 sm:$0xff] }
 0x20f   : > { %v859_v28 = vmul.f32 %v858_v25, %v2531_v30 }
 0x211   : > { %v2584_v29 = vsub.f32 %v2500_v10, %v859_v28 }
 0x213   : > { %v861_v31 = vmul.f32 %v2584_v29, %v2584_v29 }
 0x215   : > { %863 = vrot.lane.b32.xlu1 %v861_v31, %s2208_s0  ;;  %1005 = vrot.lane.b32.xlu2 %v1003_v32, %s2206_s29 }
 0x247   : > { %v583_v33 = vpop.permute.xlu2 %582 }
 0x248   : > { %v585_v34 = vsel %vm531_vm2, %v583_v33, 0.0 }
 0x249   : > { %586 = vadd.xlane.f32.xlu2 %v585_v34 }
 0x25f   : > { %v722_v35 = vpop.permute.xlu2 %721 }
 0x260   : > { %v724_v36 = vsel %vm531_vm2, %v722_v35, 0.0 }
 0x261   : > { %725 = vadd.xlane.f32.xlu1 %v724_v36 }
 0x267   : > { %v819_v10 = vpop.permute.xlu2 %818  ;;  %v677_v38 = vpop.permute.xlu1 %676 }
 0x268   : > { %v821_v37 = vsel %vm531_vm2, %v819_v10, 0.0  ;;  %v679_v39 = vsel %vm531_vm2, %v677_v38, 0.0 }
 0x269   : > { %822 = vadd.xlane.f32.xlu1 %v821_v37 }
 0x26f   : > { %v1006_v42 = vpop.permute.xlu2 %1005 }
 0x270   : > { %v1008_v20 = vsel %vm531_vm2, %v1006_v42, 0.0 }
 0x27f   : > { %680 = vadd.xlane.f32.xlu0 %v679_v39  ;;  %v961_v40 = vpop.permute.xlu1 %960 }
 0x280   : > { %v963_v41 = vsel %vm531_vm2, %v961_v40, 0.0 }
 0x281   : > { %964 = vadd.xlane.f32.xlu2 %v963_v41 }
 0x287   : > { %v2623_v25 = vpop.permute.xlu1 %863 }
 0x2ba   : > { %v625_v61 = vpop.trf.xlu0 }
 0x2bc   : > { %v587_v43 = vpop.xlane.xlu2 %586 }
 0x2bd   : > { %v588_v44 = vmul.f32 %v587_v43, %v2531_v30 }
 0x2bf   : > { %v589_v45 = vadd.f32 1e-05, %v588_v44 }
 0x2c1   : > { %1817 = vrsqrt.f32 %v589_v45  ;;  %vm596_vm8 = vweird.f32 %v589_v45 }
 0x2c7   : > { %v1818_v46 = vpop.eup %1817 }
 0x2c8   : > { %v591_v47 = vmul.f32 %v1818_v46, %v589_v45  ;;  %vm597_vm7 = vweird.f32 %v1818_v46 }
 0x2c9   : > { %vm598_vm9 = vmor %vm596_vm8, %vm597_vm7 }
 0x2ca   : > { %v592_v49 = vmul.f32 %v1818_v46, %v591_v47  ;;  %v613_v47 = vld [vmem:[#allocation2] sm:$0xff] }
 0x2cc   : > { %v593_v50 = vmul.f32 0.5, %v592_v49 }
 0x2ce   : > { %v594_v51 = vsub.f32 1.5, %v593_v50 }
 0x2d0   : > { %v595_v52 = vmul.f32 %v1818_v46, %v594_v51 }
 0x2d2   : > { %v599_v53 = vsel %vm598_vm9, %v1818_v46, %v595_v52 }
 0x2d3   : > { %v600_v55 = vmul.f32 %v599_v53, %v2544_v48 }
 0x2d4   : > { %v726_v28 = vpop.xlane.xlu1 %725 }
 0x2d5   : > { %v606_v56 = vmul.f32 %v2520_v14, %v600_v55  ;;  %v727_v34 = vmul.f32 %v726_v28, %v2531_v30 }
 0x2d7   : > { %v612_v57 = vadd.f32 %v2524_v19, %v606_v56  ;;  %v728_v36 = vadd.f32 1e-05, %v727_v34 }
 0x2d9   : > { %v616_v58 = vpack.c.bf16 %v612_v57, %v612_v57  ;;  %vm735_vm4 = vweird.f32 %v728_v36 }
 0x2db   : > { %634 = vrot.lane.b32.xlu2 %v616_v58, %s2205_s17  ;;  %v614_v58 = vld [vmem:[#allocation2 + $0x8] sm:$0xff] }
 0x2dc   : > { %v823_v31 = vpop.xlane.xlu1 %822 }
 0x2dd   : > { %v824_v33 = vmul.f32 %v823_v31, %v2531_v30 }
 0x2df   : > { %v825_v35 = vadd.f32 1e-05, %v824_v33 }
 0x2e1   : > { %vm832_vm1 = vweird.f32 %v825_v35 }
 0x2e3   : > { %839 = vrot.lane.b32.xlu2 %v1805_v59, %s2208_s0 }
 0x2eb   : > { %981 = vrot.lane.b32.xlu2 %v1806_v60, %s2211_s23 }
 0x2f2   : > { %v681_v62 = vpop.xlane.xlu0 %680 }
 0x2f3   : > { %v682_v63 = vmul.f32 %v681_v62, %v2531_v30 }
 0x2f4   : > { %v965_v12 = vpop.xlane.xlu2 %964 }
 0x2f5   : > { %v683_v0 = vadd.f32 1e-05, %v682_v63  ;;  %v966_v10 = vmul.f32 %v965_v12, %v2531_v30 }
 0x2f7   : > { %1819 = vrsqrt.f32 %v683_v0  ;;  %vm690_vm11 = vweird.f32 %v683_v0  ;;  %v967_v37 = vadd.f32 1e-05, %v966_v10 }
 0x2f8   : > { %1821 = vrsqrt.f32 %v825_v35 }
 0x2f9   : > { %1823 = vrsqrt.f32 %v728_v36  ;;  %vm974_vm7 = vweird.f32 %v967_v37 }
 0x2fa   : > { %1825 = vrsqrt.f32 %v967_v37 }
 0x2fd   : > { %v1820_v48 = vpop.eup %1819 }
 0x2fe   : > { %v685_v2 = vmul.f32 %v1820_v48, %v683_v0  ;;  %vm691_vm10 = vweird.f32 %v1820_v48  ;;  %v1822_v38 = vpop.eup %1821 }
 0x2ff   : > { %vm692_vm12 = vmor %vm690_vm11, %vm691_vm10  ;;  %v1824_v39 = vpop.eup %1823  ;;  %v827_v40 = vmul.f32 %v1822_v38, %v825_v35  ;;  %vm833_vm15 = vweird.f32 %v1822_v38 }
 0x300   : > { %v686_v14 = vmul.f32 %v1820_v48, %v685_v2  ;;  %v730_v41 = vmul.f32 %v1824_v39, %v728_v36  ;;  %v1826_v43 = vpop.eup %1825  ;;  %vm736_vm0 = vweird.f32 %v1824_v39  ;;  %vm834_vm3 = vmor %vm832_vm1, %vm833_vm15 }
 0x301   : > { %v828_v42 = vmul.f32 %v1822_v38, %v827_v40  ;;  %v969_v46 = vmul.f32 %v1826_v43, %v967_v37  ;;  %vm737_vm5 = vmor %vm735_vm4, %vm736_vm0  ;;  %vm975_vm6 = vweird.f32 %v1826_v43 }
 0x302   : > { %v687_v3 = vmul.f32 0.5, %v686_v14  ;;  %v731_v44 = vmul.f32 %v1824_v39, %v730_v41  ;;  %vm976_vm8 = vmor %vm974_vm7, %vm975_vm6 }
 0x303   : > { %v829_v45 = vmul.f32 0.5, %v828_v42  ;;  %v970_v52 = vmul.f32 %v1826_v43, %v969_v46 }
 0x304   : > { %v688_v19 = vsub.f32 1.5, %v687_v3  ;;  %v732_v49 = vmul.f32 0.5, %v731_v44 }
 0x305   : > { %v830_v51 = vsub.f32 1.5, %v829_v45  ;;  %v971_v56 = vmul.f32 0.5, %v970_v52 }
 0x306   : > { %v689_v4 = vmul.f32 %v1820_v48, %v688_v19  ;;  %v733_v55 = vsub.f32 1.5, %v732_v49 }
 0x307   : > { %v831_v57 = vmul.f32 %v1822_v38, %v830_v51  ;;  %v972_v62 = vsub.f32 1.5, %v971_v56 }
 0x308   : > { %v693_v5 = vsel %vm692_vm12, %v1820_v48, %v689_v4  ;;  %v734_v59 = vmul.f32 %v1824_v39, %v733_v55 }
 0x309   : > { %v694_v6 = vmul.f32 %v693_v5, %v2552_v54  ;;  %v1807_v54 = vld [vmem:[#allocation12 + $0x2] ss:$0 sm:$0xff]  ;;  %v835_v63 = vsel %vm834_vm3, %v1822_v38, %v831_v57  ;;  %v973_v3 = vmul.f32 %v1826_v43, %v972_v62  ;;  %v754_v62 = vld [vmem:[#allocation2 + $0x18] sm:$0xff] }
 0x30a   : > { %v738_v2 = vsel %vm737_vm5, %v1824_v39, %v734_v59  ;;  %v836_v14 = vmul.f32 %v835_v63, %v2566_v11  ;;  %v753_v59 = vld [vmem:[#allocation2 + $0x10] sm:$0xff] }
 0x30b   : > { %v700_v7 = vmul.f32 %v2518_v13, %v694_v6  ;;  %v1809_v13 = vld [vmem:[%s2806_s27 + $0x2] ss:$0 sm:$0xff]  ;;  %v739_v4 = vmul.f32 %v738_v2, %v2559_v1 }
 0x30c   : > { %884 = vrot.lane.b32.xlu2 %v1809_v13, %s2210_s9 }
 0x30d   : > { %v706_v8 = vadd.f32 %v2522_v17, %v700_v7  ;;  %v1811_v17 = vld [vmem:[%s2806_s27 + $0x3] ss:$0 sm:$0xff]  ;;  %v977_v7 = vsel %vm976_vm8, %v1826_v43, %v973_v3 }
 0x30f   : > { %v755_v9 = vpack.c.bf16 %v706_v8, %v706_v8 }
 0x311   : > { %758 = vrot.lane.b32.xlu1 %v755_v9, %s2209_s28  ;;  %v745_v9 = vmul.f32 %v2526_v23, %v739_v4 }
 0x313   : > { %v751_v11 = vadd.f32 %v2529_v27, %v745_v9  ;;  %v896_v9 = vld [vmem:[#allocation2 + $0x28] sm:$0xff] }
 0x314   : > { %1026 = vrot.lane.b32.xlu2 %v1811_v17, %s2209_s28 }
 0x315   : > { %v756_v1 = vpack.c.bf16 %v751_v11, %v751_v11 }
 0x335   : > { %v635_v15 = vpop.permute.xlu2 %634 }
 0x336   : > { %v642_v18 = vsel %vm640_vm13, %v635_v15, 0  ;;  %v978_v15 = vmul.f32 %v977_v7, %v2570_v16 }
 0x337   : > { %651 = vmatpush.bf16.msra.mxu1 %v642_v18 }
 0x33a   : > { %1530 = vmatmul.msk.bf16.vlgmr.msra.gmra.mxu1 %vm636_vm14, %v625_v61 }
 0x33b   : > { %1009 = vadd.xlane.f32.xlu1 %v1008_v20 }
 0x33d   : > { %v840_v0 = vpop.permute.xlu2 %839 }
 0x33e   : > { %v842_v19 = vmul.f32 %v840_v0, %v836_v14 }
 0x345   : > { %v982_v12 = vpop.permute.xlu2 %981 }
 0x346   : > { %v984_v18 = vmul.f32 %v982_v12, %v978_v15  ;;  %v1038_v15 = vld [vmem:[#allocation2 + $0x38] sm:$0xff] }
 0x354   : > { %845 = vrot.lane.b32.xlu1 %v1807_v54, %s2208_s0  ;;  %v866_v54 = vsel %vm531_vm2, %v2623_v25, 0.0 }
 0x35c   : > { %987 = vrot.lane.b32.xlu1 %v1808_v21, %s2211_s23 }
 0x364   : > { %890 = vrot.lane.b32.xlu1 %v1810_v22, %s2210_s9 }
 0x366   : > { %v885_v23 = vpop.permute.xlu2 %884 }
 0x36c   : > { %1032 = vrot.lane.b32.xlu1 %v1812_v24, %s2209_s28 }
 0x36e   : > { %v1027_v21 = vpop.permute.xlu2 %1026 }
 0x383   : > { %v759_v32 = vpop.permute.xlu1 %758 }
 0x384   : > { %761 = vxpose.xlu0.c.b16.start.end [1/1] (short) (narrow) %v759_v32, 16 }
 0x3ae   : > { %v1010_v60 = vpop.xlane.xlu1 %1009 }
 0x3af   : > { %v1011_v33 = vmul.f32 %v1010_v60, %v2531_v30 }
 0x3b1   : > { %v1012_v34 = vadd.f32 1e-05, %v1011_v33 }
 0x3b3   : > { %1827 = vrsqrt.f32 %v1012_v34  ;;  %vm1019_vm15 = vweird.f32 %v1012_v34 }
 0x3b7   : > { %v653_v50 = vpop.f32.mrf.mxu1 }
 0x3b8   : > { %v658_v53 = vadd.f32 %v653_v50, %v613_v47 }
 0x3b9   : > { %v1828_v35 = vpop.eup %1827 }
 0x3ba   : > { %660 = vst.msk [vmem:[#allocation2] sm:$0xff] %vm531_vm2, %v658_v53  ;;  %v1014_v37 = vmul.f32 %v1828_v35, %v1012_v34  ;;  %vm1020_vm10 = vweird.f32 %v1828_v35 }
 0x3bb   : > { %vm1021_vm0 = vmor %vm1019_vm15, %vm1020_vm10 }
 0x3bc   : > { %v1015_v38 = vmul.f32 %v1828_v35, %v1014_v37 }
 0x3be   : > { %v1016_v40 = vmul.f32 0.5, %v1015_v38 }
 0x3bf   : > { %v655_v61 = vpop.f32.mrf.mxu1 }
 0x3c0   : > { %v659_v48 = vadd.f32 %v655_v61, %v614_v58  ;;  %v1017_v43 = vsub.f32 1.5, %v1016_v40 }
 0x3c2   : > { %661 = vst.msk [vmem:[#allocation2 + $0x8] sm:$0xff] %vm531_vm2, %v659_v48  ;;  %v1018_v46 = vmul.f32 %v1828_v35, %v1017_v43 }
 0x3c4   : > { %v1022_v50 = vsel %vm1021_vm0, %v1828_v35, %v1018_v46 }
 0x3c5   : > { %v1023_v52 = vmul.f32 %v1022_v50, %v2580_v26 }
 0x3c6   : > { %v846_v5 = vpop.permute.xlu1 %845 }
 0x3c7   : > { %v848_v6 = vadd.f32 %v846_v5, %v842_v19  ;;  %v1029_v56 = vmul.f32 %v1027_v21, %v1023_v52  ;;  %v895_v19 = vld [vmem:[#allocation2 + $0x20] sm:$0xff]  ;;  %v1037_v5 = vld [vmem:[#allocation2 + $0x30] sm:$0xff] }
 0x3c9   : > { %v897_v8 = vpack.c.bf16 %v848_v6, %v848_v6 }
 0x3cb   : > { %900 = vrot.lane.b32.xlu2 %v897_v8, %s2210_s9 }
 0x3ce   : > { %v988_v20 = vpop.permute.xlu1 %987 }
 0x3cf   : > { %v990_v13 = vadd.f32 %v988_v20, %v984_v18 }
 0x3d1   : > { %v1039_v17 = vpack.c.bf16 %v990_v13, %v990_v13 }
 0x3d3   : > { %778 = vrot.lane.b32.xlu2 %v756_v1, %s2211_s23  ;;  %1042 = vrot.lane.b32.xlu1 %v1039_v17, %s2207_s1 }
 0x3d6   : > { %v891_v28 = vpop.permute.xlu1 %890 }
 0x3de   : > { %v1033_v31 = vpop.permute.xlu1 %1032 }
 0x3df   : > { %v1035_v57 = vadd.f32 %v1033_v31, %v1029_v56 }
 0x3e1   : > { %v1040_v58 = vpack.c.bf16 %v1035_v57, %v1035_v57 }
 0x3f5   : > { %867 = vadd.xlane.f32.xlu0 %v866_v54 }
 0x425   : > { %v901_v16 = vpop.permute.xlu2 %900 }
 0x42d   : > { %v779_v22 = vpop.permute.xlu2 %778 }
 0x42e   : > { %v784_v24 = vsel %vm640_vm13, %v779_v22, 0 }
 0x42f   : > { %793 = vmatpush.bf16.msra.mxu2 %v784_v24 }
 0x430   : > { %v769_v27 = vpop.trf.xlu0 }
 0x432   : > { %1532 = vmatmul.msk.bf16.vlgmr.msra.gmra.mxu2 %vm636_vm14, %v769_v27 }
 0x445   : > { %v1043_v32 = vpop.permute.xlu1 %1042 }
 0x446   : > { %1794 = vxpose.binary.xlu1.c.b16.start.end [1/2] (short) (narrow) %v1043_v32, %v901_v16, 16 }
 0x468   : > { %v868_v25 = vpop.xlane.xlu0 %867 }
 0x469   : > { %v869_v36 = vmul.f32 %v868_v25, %v2531_v30 }
 0x46b   : > { %v870_v10 = vadd.f32 1e-05, %v869_v36 }
 0x46d   : > { %1829 = vrsqrt.f32 %v870_v10  ;;  %vm877_vm11 = vweird.f32 %v870_v10 }
 0x473   : > { %v1830_v39 = vpop.eup %1829 }
 0x474   : > { %v872_v41 = vmul.f32 %v1830_v39, %v870_v10  ;;  %vm878_vm9 = vweird.f32 %v1830_v39 }
 0x475   : > { %vm879_vm12 = vmor %vm877_vm11, %vm878_vm9 }
 0x476   : > { %v873_v42 = vmul.f32 %v1830_v39, %v872_v41 }
 0x478   : > { %v874_v44 = vmul.f32 0.5, %v873_v42 }
 0x47a   : > { %v875_v45 = vsub.f32 1.5, %v874_v44 }
 0x47c   : > { %v876_v47 = vmul.f32 %v1830_v39, %v875_v45 }
 0x47e   : > { %v880_v49 = vsel %vm879_vm12, %v1830_v39, %v876_v47 }
 0x47f   : > { %v881_v30 = vmul.f32 %v880_v49, %v2584_v29 }
 0x481   : > { %v887_v51 = vmul.f32 %v885_v23, %v881_v30 }
 0x483   : > { %v893_v53 = vadd.f32 %v891_v28, %v887_v51 }
 0x485   : > { %v898_v55 = vpack.c.bf16 %v893_v53, %v893_v53 }
 0x487   : > { %920 = vrot.lane.b32.xlu2 %v898_v55, %s2208_s0 }
 0x48f   : > { %1062 = vrot.lane.b32.xlu2 %v1040_v58, %s2206_s29 }
 0x4b5   : > { %v795_v60 = vpop.f32.mrf.mxu2 }
 0x4b6   : > { %v800_v61 = vadd.f32 %v795_v60, %v753_v59 }
 0x4b8   : > { %802 = vst.msk [vmem:[#allocation2 + $0x10] sm:$0xff] %vm531_vm2, %v800_v61 }
 0x4bd   : > { %v797_v29 = vpop.f32.mrf.mxu2 }
 0x4be   : > { %v801_v63 = vadd.f32 %v797_v29, %v754_v62 }
 0x4c0   : > { %803 = vst.msk [vmem:[#allocation2 + $0x18] sm:$0xff] %vm531_vm2, %v801_v63 }
 0x4e1   : > { %v921_v26 = vpop.permute.xlu2 %920 }
 0x4e2   : > { %v926_v0 = vsel %vm640_vm13, %v921_v26, 0 }
 0x4e3   : > { %935 = vmatpush.bf16.msra.mxu3 %v926_v0 }
 0x4e9   : > { %v1063_v48 = vpop.permute.xlu2 %1062 }
 0x4ea   : > { %v1068_v2 = vsel %vm640_vm13, %v1063_v48, 0 }
 0x4eb   : > { %1077 = vmatpush.bf16.msrb.mxu1 %v1068_v2 }
 0x4f2   : > { %v1795_v14 = vpop.trf.xlu1 }
 0x4f3   : > { %1534 = vmatmul.msk.bf16.vlgmr.msra.gmra.mxu3 %vm636_vm14, %v1795_v14 }
 0x4fa   : > { %v1796_v3 = vpop.trf.xlu1 }
 0x4fb   : > { %1536 = vmatmul.msk.bf16.vlgmr.msrb.gmra.mxu1 %vm636_vm14, %v1796_v3 }
 0x576   : > { %v937_v4 = vpop.f32.mrf.mxu3 }
 0x577   : > { %v942_v6 = vadd.f32 %v937_v4, %v895_v19 }
 0x578   : > { %v1079_v7 = vpop.f32.mrf.mxu1 }
 0x579   : > { %944 = vst.msk [vmem:[#allocation2 + $0x20] sm:$0xff] %vm531_vm2, %v942_v6  ;;  %v1084_v8 = vadd.f32 %v1079_v7, %v1037_v5 }
 0x57b   : > { %1086 = vst.msk [vmem:[#allocation2 + $0x30] sm:$0xff] %vm531_vm2, %v1084_v8 }
 0x57e   : > { %v939_v12 = vpop.f32.mrf.mxu3 }
 0x57f   : > { %v943_v18 = vadd.f32 %v939_v12, %v896_v9 }
 0x580   : > { %v1081_v11 = vpop.f32.mrf.mxu1 }
 0x581   : > { %945 = vst.msk [vmem:[#allocation2 + $0x28] sm:$0xff] %vm531_vm2, %v943_v18  ;;  %v1085_v20 = vadd.f32 %v1081_v11, %v1038_v15 }
 0x583   : > { %1087 = vst.msk [vmem:[#allocation2 + $0x38] sm:$0xff] %vm531_vm2, %v1085_v20 }
 0x584 PF: > { %s2807_s29 = sld [smem:[#allocation24_spill]] }
 0x585   : > { %s2808_s12 = sld [smem:[#allocation23_spill]] }
 0x58a   : > { %p1088_p1 = scmp.eq.s32.totalorder %s2807_s29, 1 }
 0x58b   : > { %p1089_p12 = scmp.eq.s32.totalorder %s2808_s12, 0 }
 0x58d   : > { %p1090_p0 = pnand %p1089_p12, %p1088_p1 }
 0x58f   : > { %1093 = sbr.rel (%p1090_p0) target bundleno = 1580 (0x62c), region = 96 }
 0x594   : > { %v1591_v13 = vld [vmem:[#allocation15] sm:$0xff]  ;;  %v1592_v17 = vld [vmem:[#allocation15 + $0x8] sm:$0xff]  ;;  %v1593_v1 = vld [vmem:[#allocation15 + $0x10] sm:$0xff]  ;;  %vm1107_vm13 = vcmask 130048   ;;  %vm1127_vm2 = vcmask 257024  }
 0x595   : > { %v1594_v54 = vld [vmem:[#allocation15 + $0x18] sm:$0xff]  ;;  %v1094_v23 = vld [vmem:[#allocation2] sm:$0xff]  ;;  %1118 = vmatpush.bf16.msra.mxu0 %v1591_v13  ;;  %1155 = vmatpush.bf16.msra.mxu1 %v1592_v17  ;;  %v1132_v27 = vld [vmem:[#allocation2 + $0x18] sm:$0xff] }
 0x596   : > { %v1095_v21 = vld [vmem:[#allocation2 + $0x8] sm:$0xff]  ;;  %v1096_v16 = vmul.f32 0.0625, %v1094_v23  ;;  %v1131_v24 = vld [vmem:[#allocation2 + $0x10] sm:$0xff]  ;;  %v1167_v28 = vld [vmem:[#allocation2 + $0x20] sm:$0xff]  ;;  %1191 = vmatpush.bf16.msra.mxu2 %v1593_v1  ;;  %1227 = vmatpush.bf16.msra.mxu3 %v1594_v54  ;;  %v1134_v32 = vmul.f32 0.0625, %v1132_v27 }
 0x597   : > { %v1097_v22 = vmul.f32 0.0625, %v1095_v21  ;;  %v1133_v31 = vmul.f32 0.0625, %v1131_v24  ;;  %v1168_v33 = vld [vmem:[#allocation2 + $0x28] sm:$0xff]  ;;  %v1169_v34 = vmul.f32 0.0625, %v1167_v28  ;;  %v1203_v25 = vld [vmem:[#allocation2 + $0x30] sm:$0xff]  ;;  %v1204_v35 = vld [vmem:[#allocation2 + $0x38] sm:$0xff] }
 0x598   : > { %v1170_v10 = vmul.f32 0.0625, %v1168_v33  ;;  %v1205_v37 = vmul.f32 0.0625, %v1203_v25  ;;  %v1206_v38 = vmul.f32 0.0625, %v1204_v35 }
 0x599   : > { %v1098_v36 = vpack.c.bf16 %v1097_v22, %v1096_v16  ;;  %v1135_v39 = vpack.c.bf16 %v1134_v32, %v1133_v31 }
 0x59a   : > { %v1171_v40 = vpack.c.bf16 %v1170_v10, %v1169_v34  ;;  %v1207_v41 = vpack.c.bf16 %v1206_v38, %v1205_v37 }
 0x59b   : > { %1541 = vmatmul.msk.bf16.vlgmr.msra.gmra.mxu0 %vm1107_vm13, %v1098_v36  ;;  %1546 = vmatmul.msk.bf16.vlgmr.msra.gmra.mxu1 %vm1107_vm13, %v1135_v39 }
 0x59c   : > { %1551 = vmatmul.msk.bf16.vlgmr.msra.gmra.mxu2 %vm1107_vm13, %v1171_v40  ;;  %1556 = vmatmul.msk.bf16.vlgmr.msra.gmra.mxu3 %vm1107_vm13, %v1207_v41 }
 0x618   : > { %v1120_v42 = vpop.f32.mrf.mxu0  ;;  %v1157_v44 = vpop.f32.mrf.mxu1 }
 0x619   : > { %v1125_v43 = vpack.c.bf16 %v1120_v42, %v1120_v42  ;;  %v1162_v45 = vpack.c.bf16 %v1157_v44, %v1157_v44 }
 0x61b   : > { %1128 = vst.msk [vmem:[#allocation3] sm:$0xf] %vm1127_vm2, %v1125_v43 }
 0x61c   : > { %1164 = vst.msk [vmem:[#allocation3 + $0x8] sm:$0xf] %vm1127_vm2, %v1162_v45 }
 0x61f   : > { %v1193_v46 = vpop.f32.mrf.mxu2  ;;  %v1229_v47 = vpop.f32.mrf.mxu3 }
 0x620   : > { %v1198_v49 = vpack.c.bf16 %v1193_v46, %v1193_v46  ;;  %v1234_v30 = vpack.c.bf16 %v1229_v47, %v1229_v47  ;;  %v1122_v50 = vpop.f32.mrf.mxu0  ;;  %v1159_v51 = vpop.f32.mrf.mxu1 }
 0x621   : > { %v1126_v52 = vpack.c.bf16 %v1122_v50, %v1122_v50  ;;  %v1163_v53 = vpack.c.bf16 %v1159_v51, %v1159_v51 }
 0x622   : > { %1200 = vst.msk [vmem:[#allocation3 + $0x10] sm:$0xf] %vm1127_vm2, %v1198_v49 }
 0x623   : > { %1236 = vst.msk [vmem:[#allocation3 + $0x18] sm:$0xf] %vm1127_vm2, %v1234_v30 }
 0x624   : > { %1129 = vst.msk [vmem:[#allocation3 + $0x4] sm:$0xf] %vm1127_vm2, %v1126_v52 }
 0x625   : > { %1165 = vst.msk [vmem:[#allocation3 + $0xc] sm:$0xf] %vm1127_vm2, %v1163_v53 }
 0x627   : > { %v1195_v55 = vpop.f32.mrf.mxu2  ;;  %v1231_v56 = vpop.f32.mrf.mxu3 }
 0x628   : > { %v1199_v57 = vpack.c.bf16 %v1195_v55, %v1195_v55  ;;  %v1235_v58 = vpack.c.bf16 %v1231_v56, %v1231_v56 }
 0x62a   : > { %1201 = vst.msk [vmem:[#allocation3 + $0x14] sm:$0xf] %vm1127_vm2, %v1199_v57 }
 0x62b   : > { %1237 = vst.msk [vmem:[#allocation3 + $0x1c] sm:$0xf] %vm1127_vm2, %v1235_v58 }
 0x62c PF: > { %s2809_s1 = sld [smem:[#allocation24_spill]] }
 0x632   : > { %p1557_p2 = scmp.ne.s32.totalorder %s2809_s1, 1 }
 0x633   : > { %s2810_s9 = sld [smem:[#allocation38_spill]] (!%p1557_p2) }
 0x634   : > { %1240 = sbr.rel (%p1557_p2) target bundleno = 1863 (0x747), region = 100 }
 0x639   : > { %v1596_v59 = vld [vmem:[#allocation9 + $0x8] sm:$0xff]  ;;  %v1600_v60 = vld [vmem:[#allocation3 + $0x18] sm:$0xff]  ;;  %v1599_v62 = vld [vmem:[#allocation3 + $0x10] sm:$0xff]  ;;  %vm1258_vm14 = vcmask 261120   ;;  %vm1312_vm1 = vcmask 523264  }
 0x63a   : > { %1268 = vmatpush.bf16.msra.mxu0 %v1596_v59  ;;  %v1595_v61 = vld [vmem:[#allocation9] sm:$0xff]  ;;  %1320 = vmatpush.bf16.msra.mxu1 %v1600_v60  ;;  %v1241_v29 = vld [vmem:[%s410_s16] sm:$0xf]  ;;  %v1598_v63 = vld [vmem:[#allocation3 + $0x8] sm:$0xff] }
 0x63b   : > { %v1597_v26 = vld [vmem:[#allocation3] sm:$0xff] }
 0x63c   : > { %v1831_v14 = vld [vmem:[%s2810_s9] ss:$0 sm:$0xff] }
 0x63e   : > { %1269 = vmatpush.bf16.msra.mxu0 %v1595_v61  ;;  %1321 = vmatpush.bf16.msra.mxu1 %v1599_v62 }
 0x641   : > { %1566 = vmatmul.msk.bf16.vlgmr.msra.gmra.mxu0 %vm1258_vm14, %v1241_v29 }
 0x642   : > { %1322 = vmatpush.bf16.msra.mxu1 %v1598_v63 }
 0x646   : > { %1323 = vmatpush.bf16.msra.mxu1 %v1597_v26 }
 0x6be   : > { %v1271_v0 = vpop.f32.mrf.mxu0 }
 0x6bf   : > { %v1275_v48 = vpack.c.bf16 %v1271_v0, %v1271_v0 }
 0x6c1   : > { %1583 = vmatmul.msk.bf16.vlgmr.msra.gmra.mxu1 %vm1312_vm1, %v1275_v48 }
 0x6c6   : > { %v1273_v2 = vpop.f32.mrf.mxu0 }
 0x73e   : > { %v1325_v3 = vpop.f32.mrf.mxu1 }
 0x73f   : > { %v1326_v19 = vadd.f32 %v1831_v14, %v1325_v3 }
 0x741   : > { %1329 = vst.msk [vmem:[%s475_s5] sm:$0xff] %vm1258_vm14, %v1326_v19 }
 0x746   : > { %v1327_v4 = vpop.f32.mrf.mxu1 }
 0x747 PF: > { %s2811_s3 = sld [smem:[#allocation24_spill]]  ;;  %s1346_s17 = sshll.u32 %s475_s5, 4  ;;  %s1347_s17 = int_to_ptr.vmem [resolvable:$true] %s1346_s17 }
 0x748   : > { %s2812_s16 = sld [smem:[#allocation23_spill]]  ;;  %s1331_s27 = scalar_lea.sflag [#allocation6], %s473_s6 }
 0x749   : > { %s2813_s23 = sld [smem:[#allocation25_spill]] }
 0x74a   : > { %s2814_s0 = sld [smem:[#allocation39_spill]] }
 0x74e   : > { %s1338_s22 = smul.u32 %s2812_s16, %s2811_s3 }
 0x74f   : > { %s1585_s30 = sshll.u32 %s2813_s23, 1 }
 0x750   : > { %s1342_s15 = sadd.s32 %s1585_s30, %s1338_s22  ;;  %s2062_s3 = scalar_lea.hbm %s2814_s0, 32 }
 0x751   : > { %s1586_s29 = sshll.u32 %s1342_s15, 3 }
 0x752   : > { %s1344_s28 = scalar_lea.hbm %s2814_s0, %s1586_s29 }
 0x753   : > { %s1348_s9 = sshll.u32 %s1344_s28, 4  ;;  %s1349_s9 = int_to_ptr.hbm [resolvable:$true] %s1348_s9 }
 0x754   : > { %s2056_s24 = sshra.s32 %s1349_s9, 4  ;;  %s2057_s24 = int_to_ptr.hbm [resolvable:$true] %s2056_s24 }
 0x755   : > { %s2058_s8 = scalar_lea.hbm %s2057_s24, 8  ;;  %p2063_p8 = scmp.lt.s32.totalorder %s2057_s24, %s2814_s0 }
 0x756   : > { %p2059_p4 = scmp.ne.s32.totalorder %s2057_s24, %s2058_s8  ;;  %p2064_p10 = scmp.lt.s32.totalorder %s2062_s3, %s2058_s8 }
 0x758   : > { %p2060_p5 = pnand %p2059_p4, %p2431_p7  ;;  %p2065_p13 = por %p2064_p10, %p2063_p8 }
 0x75a   : > { %p2061_p6 = pneg %p2060_p5 }
 0x75c   : > { %p2066_p3 = pnand %p2065_p13, %p2061_p6 }
 0x75e   : > { %2069 = shalt.err (!%p2066_p3)
}
 0x75f   : > { %1627 = dma.vmem_to_hbm [thread:$0]  (%p2431_p7), %s1347_s17, 128, %s1349_s9, %s1331_s27  }
 0x760 PF: > { %s2815_s6 = sld [smem:[#allocation22_spill]]  ;;  %p1669_p11 = scmp.ge.s32.totalorder %s2192_s21, 2 }
 0x762   : > { %p1653_p1 = pnand %p1669_p11, %p2443_p9 }
 0x764   : > { %p1654_p12 = pneg %p1653_p1 }
 0x766   : > { %s1360_s22 = sand.u32 1, %s2815_s6  }
 0x767   : > { %s1361_s30 = scalar_lea.sflag [#allocation6], %s1360_s22 }
 0x768   : > { %2139 = dma.done.wait (%p1654_p12), %s1361_s30, 128  }
 0x769   : > { %2141 = vsyncadd (%p1654_p12), %s1361_s30, 4294967168  ;;  %s28_s21 = sadd.s32 1, %s2192_s21   ;;  %s2817_s24 = sld [smem:[#allocation27_spill]] }
 0x76a   : > { %p2706_p0 = scmp.ge.s32.totalorder %s28_s21, 10   ;;  %s2818_s26 = sld [smem:[#allocation28_spill]] }
 0x76b   : > { %s2819_s25 = sld [smem:[#allocation29_spill]]  ;;  %s2820_s30 = smov %s2148_s10 }
 0x76c   : > { %s2821_s10 = smov %s2152_s11  ;;  %s2822_s11 = smov %s2441_s4 }
 0x76d   : > { %s2823_s12 = smov %s2160_s13  ;;  %s2824_s13 = smov %s2164_s14 }
 0x76e   : > { %s2825_s14 = smov %s2438_s2  ;;  %s2826_s15 = smov %s2180_s18 }
 0x76f   : > { %s2827_s16 = smov %s2184_s19  ;;  %s2828_s17 = smov %s2188_s20 }
 0x770   : > { %s2829_s18 = smov %s2817_s24  ;;  %s2830_s19 = smov %s2818_s26 }
 0x771   : > { %s2831_s20 = smov %s2819_s25  ;;  %27 = sbr.rel (!%p2706_p0) target bundleno = 24 (0x18), region = 162 }
 0x776   :  { %1367 = vsyncpa [#allocation5], 1 }
 0x777   :  { %1369 = vsyncpa [#allocation5 + $0x1], 1 }
 0x778   :  { %1370 = vsyncpa [#allocation8], 1 }
 0x779   :  { %1371 = vsyncpa [#allocation11], 1 }
 0x77a   :  { %1372 = vsyncpa [#allocation14], 1 }
 0x77b   :  { %1373 = vsyncpa [#allocation6], 1 }
 0x77c   :  { %1375 = vsyncpa [#allocation6 + $0x1], 1 }

</bundles_post_ra>
